<compile_context>
chip_gen: v7x
topology: tpu7x:2x2x1
jax: 0.10.0
libtpu: 0.0.40
codegen_flags: <defaults>
</compile_context>

<pallas_src>
import math

import jax
import jax.numpy as jnp
from jax.experimental import pallas as pl
from jax.experimental.pallas import tpu as pltpu


def _round_up(x, m):
    return ((x + m - 1) // m) * m


def _dequant_bf16(wq_ref):
    # int8 -> f32 -> bf16: every int8 value is exactly representable in bf16;
    # routed through f32 because s8->f32 and f32->bf16 are the universally
    # supported Mosaic converts.  Cheap VPU work; kernel is DMA-bound.
    return wq_ref[...].astype(jnp.float32).astype(jnp.bfloat16)


def actor_kernel(s_ref, w1_ref, sc1_ref, b1_ref, w2_ref, sc2_ref, b2_ref,
                 w3_ref, sc3_ref, b3_ref, out_ref):
    # layer 1: Linear(state -> 800) + ReLU   (bf16 MXU matmul, f32 accumulate,
    # per-output-channel dequant scale applied after the accumulate)
    x = s_ref[...].astype(jnp.bfloat16)
    h1 = jnp.dot(x, _dequant_bf16(w1_ref), preferred_element_type=jnp.float32)
    h1 = jnp.maximum(h1 * sc1_ref[...] + b1_ref[...], 0.0)
    # layer 2: Linear(800 -> 600) + ReLU
    h2 = jnp.dot(h1.astype(jnp.bfloat16), _dequant_bf16(w2_ref),
                 preferred_element_type=jnp.float32)
    h2 = jnp.maximum(h2 * sc2_ref[...] + b2_ref[...], 0.0)
    # layer 3: Linear(600 -> action_dim) + Tanh   (tanh -> EUP, f32)
    h3 = jnp.dot(h2.astype(jnp.bfloat16), _dequant_bf16(w3_ref),
                 preferred_element_type=jnp.float32)
    out_ref[...] = jnp.tanh(h3 * sc3_ref[...] + b3_ref[...]).astype(out_ref.dtype)


def actor_forward(s, kernel_params, action_dim):
    """Fused 3-layer MLP forward on padded, int8-quantized params."""
    w1, sc1, b1, w2, sc2, b2, w3, sc3, b3 = kernel_params
    B, state_dim = s.shape
    SP, H1P = w1.shape
    H2P = w2.shape[1]
    AP = w3.shape[1]

    # Pad batch: small batches -> single sublane-aligned tile; large batches ->
    # 256-row tiles streamed over a parallel grid axis (amortizes per-step overhead).
    if B <= 256:
        Bp = max(_round_up(B, 8), 8)
        block_b = Bp
    else:
        block_b = 256
        Bp = _round_up(B, block_b)
    nb = Bp // block_b

    # Zero-pad activations to (Bp, SP); zero rows/cols contribute nothing real.
    s_p = jnp.zeros((Bp, SP), jnp.float32).at[:B, :state_dim].set(s)

    out_padded = pl.pallas_call(
        actor_kernel,
        out_shape=jax.ShapeDtypeStruct((Bp, AP), jnp.float32),
        grid=(nb,),
        in_specs=[
            pl.BlockSpec((block_b, SP), lambda i: (i, 0)),   # activations stream
            pl.BlockSpec((SP, H1P), lambda i: (0, 0)),       # weights/scales/biases:
            pl.BlockSpec((1, H1P), lambda i: (0, 0)),        #  constant block index
            pl.BlockSpec((1, H1P), lambda i: (0, 0)),        #  -> fetched once,
            pl.BlockSpec((H1P, H2P), lambda i: (0, 0)),      #     VMEM-resident
            pl.BlockSpec((1, H2P), lambda i: (0, 0)),
            pl.BlockSpec((1, H2P), lambda i: (0, 0)),
            pl.BlockSpec((H2P, AP), lambda i: (0, 0)),
            pl.BlockSpec((1, AP), lambda i: (0, 0)),
            pl.BlockSpec((1, AP), lambda i: (0, 0)),
        ],
        out_specs=pl.BlockSpec((block_b, AP), lambda i: (i, 0)),
        compiler_params=pltpu.CompilerParams(
            dimension_semantics=("parallel",),
            vmem_limit_bytes=32 << 20,
        ),
    )(s_p, w1, sc1, b1, w2, sc2, b2, w3, sc3, b3)

    return out_padded[:B, :action_dim]


def init_params(key, state_dim, action_dim):
    """Deterministic init mimicking PyTorch nn.Linear default (uniform +/- 1/sqrt(fan_in)).
    Weights are pre-transposed as (in, out). Returned in f32 at logical shapes."""
    def linear(key, fan_in, fan_out):
        kw, kb = jax.random.split(key)
        bound = 1.0 / math.sqrt(fan_in)
        w = jax.random.uniform(kw, (fan_in, fan_out), jnp.float32, -bound, bound)
        b = jax.random.uniform(kb, (fan_out,), jnp.float32, -bound, bound)
        return w, b

    k1, k2, k3 = jax.random.split(key, 3)
    w1, b1 = linear(k1, state_dim, 800)
    w2, b2 = linear(k2, 800, 600)
    w3, b3 = linear(k3, 600, action_dim)
    return (w1, b1, w2, b2, w3, b3)


def prepare_kernel_params(params):
    """Zero-pad feature dims (rows to 32, the int8 sublane tile; columns to 128,
    the lane width) and quantize weights to int8 with per-output-channel f32
    scales.  Biases stay f32.  Zero padding keeps math on the real dims identical."""
    w1, b1, w2, b2, w3, b3 = params

    def quantize(w, rp, cp):
        wp = jnp.zeros((rp, cp), jnp.float32).at[: w.shape[0], : w.shape[1]].set(w)
        max_abs = jnp.max(jnp.abs(wp), axis=0, keepdims=True)          # (1, cp)
        scale = jnp.where(max_abs > 0.0, max_abs / 127.0, 1.0)         # avoid /0 on pad cols
        wq = jnp.clip(jnp.round(wp / scale), -127.0, 127.0).astype(jnp.int8)
        return wq, scale.astype(jnp.float32)

    def pad_b(b, cp):
        return jnp.zeros((1, cp), jnp.float32).at[0, : b.shape[0]].set(b)

    SP = max(_round_up(w1.shape[0], 32), 32)     # 24 -> 32 (was 128)
    H1P = _round_up(w1.shape[1], 128)            # 800 -> 896
    H2P = _round_up(w2.shape[1], 128)            # 600 -> 640
    AP = _round_up(w3.shape[1], 128)             # action_dim -> 128

    w1q, sc1 = quantize(w1, SP, H1P)
    w2q, sc2 = quantize(w2, H1P, H2P)
    w3q, sc3 = quantize(w3, H2P, AP)
    return (w1q, sc1, pad_b(b1, H1P),
            w2q, sc2, pad_b(b2, H2P),
            w3q, sc3, pad_b(b3, AP))


def actor_ref(s, params):
    """Pure-JAX f32 reference (matches the PyTorch module)."""
    w1, b1, w2, b2, w3, b3 = params
    h = jnp.maximum(s @ w1 + b1, 0.0)
    h = jnp.maximum(h @ w2 + b2, 0.0)
    return jnp.tanh(h @ w3 + b3)


if __name__ == "__main__":
    state_dim = 24
    action_dim = 4
    batch = 2

    key = jax.random.PRNGKey(0)
    k_params, k_state = jax.random.split(key)
    params = init_params(k_params, state_dim, action_dim)
    kernel_params = prepare_kernel_params(params)
    s = jax.random.normal(k_state, (batch, state_dim), jnp.float32)

    out = actor_forward(s, kernel_params, action_dim)
    out = jax.block_until_ready(out)

    ref = actor_ref(s, params)
    assert out.shape == (batch, action_dim)
    # int8 per-channel weights + bf16 MXU operands -> small drift vs f32 reference.
    assert jnp.allclose(out, ref, atol=2e-2, rtol=2e-2), "mismatch vs f32 reference"

    print("KERNEL_OK")
</pallas_src>

<mosaic_0001>
module attributes {stable_mosaic.version = 11 : i64} {
  func.func @actor_kernel(%arg0: i32, %arg1: memref<8x32xf32, #tpu.memory_space<vmem>>, %arg2: memref<32x896xi8, #tpu.memory_space<vmem>>, %arg3: memref<1x896xf32, #tpu.memory_space<vmem>>, %arg4: memref<1x896xf32, #tpu.memory_space<vmem>>, %arg5: memref<896x640xi8, #tpu.memory_space<vmem>>, %arg6: memref<1x640xf32, #tpu.memory_space<vmem>>, %arg7: memref<1x640xf32, #tpu.memory_space<vmem>>, %arg8: memref<640x128xi8, #tpu.memory_space<vmem>>, %arg9: memref<1x128xf32, #tpu.memory_space<vmem>>, %arg10: memref<1x128xf32, #tpu.memory_space<vmem>>, %arg11: memref<8x128xf32, #tpu.memory_space<vmem>>) attributes {dimension_semantics = [#tpu.dimension_semantics<parallel>], iteration_bounds = array<i64: 1>, scalar_prefetch = 0 : i64, scratch_operands = 0 : i64, tpu.core_type = #tpu.core_type<tc>, window_params = [{transform_indices = @transform_0, window_bounds = array<i64: 8, 32>}, {pipeline_mode = #tpu.pipeline_mode<synchronous>, transform_indices = @transform_1, window_bounds = array<i64: 32, 896>}, {pipeline_mode = #tpu.pipeline_mode<synchronous>, transform_indices = @transform_2, window_bounds = array<i64: 1, 896>}, {pipeline_mode = #tpu.pipeline_mode<synchronous>, transform_indices = @transform_3, window_bounds = array<i64: 1, 896>}, {pipeline_mode = #tpu.pipeline_mode<synchronous>, transform_indices = @transform_4, window_bounds = array<i64: 896, 640>}, {pipeline_mode = #tpu.pipeline_mode<synchronous>, transform_indices = @transform_5, window_bounds = array<i64: 1, 640>}, {pipeline_mode = #tpu.pipeline_mode<synchronous>, transform_indices = @transform_6, window_bounds = array<i64: 1, 640>}, {pipeline_mode = #tpu.pipeline_mode<synchronous>, transform_indices = @transform_7, window_bounds = array<i64: 640, 128>}, {pipeline_mode = #tpu.pipeline_mode<synchronous>, transform_indices = @transform_8, window_bounds = array<i64: 1, 128>}, {pipeline_mode = #tpu.pipeline_mode<synchronous>, transform_indices = @transform_9, window_bounds = array<i64: 1, 128>}, {transform_indices = @transform_10, window_bounds = array<i64: 8, 128>}]} {
    %c0 = arith.constant 0 : index
    %c0_0 = arith.constant 0 : index
    %0 = vector.load %arg1[%c0, %c0_0] : memref<8x32xf32, #tpu.memory_space<vmem>>, vector<8x32xf32>
    %1 = arith.truncf %0 : vector<8x32xf32> to vector<8x32xbf16>
    %c0_1 = arith.constant 0 : index
    %c0_2 = arith.constant 0 : index
    %2 = vector.load %arg2[%c0_1, %c0_2] : memref<32x896xi8, #tpu.memory_space<vmem>>, vector<32x896xi8>
    %3 = arith.sitofp %2 : vector<32x896xi8> to vector<32x896xf32>
    %4 = arith.truncf %3 : vector<32x896xf32> to vector<32x896xbf16>
    %cst = arith.constant dense<0.000000e+00> : vector<8x896xf32>
    %5 = tpu.matmul %1, %4, %cst {dimension_numbers = #tpu.dot_dimension_numbers<[1], [0], [0], [1], [0, 0, 1, 1], [], []>} : vector<8x32xbf16>, vector<32x896xbf16>, vector<8x896xf32> -> vector<8x896xf32>
    %c0_3 = arith.constant 0 : index
    %c0_4 = arith.constant 0 : index
    %6 = vector.load %arg3[%c0_3, %c0_4] : memref<1x896xf32, #tpu.memory_space<vmem>>, vector<1x896xf32>
    %7 = vector.broadcast %6 : vector<1x896xf32> to vector<8x896xf32>
    %8 = arith.mulf %5, %7 : vector<8x896xf32>
    %c0_5 = arith.constant 0 : index
    %c0_6 = arith.constant 0 : index
    %9 = vector.load %arg4[%c0_5, %c0_6] : memref<1x896xf32, #tpu.memory_space<vmem>>, vector<1x896xf32>
    %10 = vector.broadcast %9 : vector<1x896xf32> to vector<8x896xf32>
    %11 = arith.addf %8, %10 : vector<8x896xf32>
    %cst_7 = arith.constant 0.000000e+00 : f32
    %12 = vector.broadcast %cst_7 : f32 to vector<8x896xf32>
    %13 = arith.maximumf %11, %12 : vector<8x896xf32>
    %14 = arith.truncf %13 : vector<8x896xf32> to vector<8x896xbf16>
    %c0_8 = arith.constant 0 : index
    %c0_9 = arith.constant 0 : index
    %15 = vector.load %arg5[%c0_8, %c0_9] : memref<896x640xi8, #tpu.memory_space<vmem>>, vector<896x640xi8>
    %16 = arith.sitofp %15 : vector<896x640xi8> to vector<896x640xf32>
    %17 = arith.truncf %16 : vector<896x640xf32> to vector<896x640xbf16>
    %cst_10 = arith.constant dense<0.000000e+00> : vector<8x640xf32>
    %18 = tpu.matmul %14, %17, %cst_10 {dimension_numbers = #tpu.dot_dimension_numbers<[1], [0], [0], [1], [0, 0, 1, 1], [], []>} : vector<8x896xbf16>, vector<896x640xbf16>, vector<8x640xf32> -> vector<8x640xf32>
    %c0_11 = arith.constant 0 : index
    %c0_12 = arith.constant 0 : index
    %19 = vector.load %arg6[%c0_11, %c0_12] : memref<1x640xf32, #tpu.memory_space<vmem>>, vector<1x640xf32>
    %20 = vector.broadcast %19 : vector<1x640xf32> to vector<8x640xf32>
    %21 = arith.mulf %18, %20 : vector<8x640xf32>
    %c0_13 = arith.constant 0 : index
    %c0_14 = arith.constant 0 : index
    %22 = vector.load %arg7[%c0_13, %c0_14] : memref<1x640xf32, #tpu.memory_space<vmem>>, vector<1x640xf32>
    %23 = vector.broadcast %22 : vector<1x640xf32> to vector<8x640xf32>
    %24 = arith.addf %21, %23 : vector<8x640xf32>
    %cst_15 = arith.constant 0.000000e+00 : f32
    %25 = vector.broadcast %cst_15 : f32 to vector<8x640xf32>
    %26 = arith.maximumf %24, %25 : vector<8x640xf32>
    %27 = arith.truncf %26 : vector<8x640xf32> to vector<8x640xbf16>
    %c0_16 = arith.constant 0 : index
    %c0_17 = arith.constant 0 : index
    %28 = vector.load %arg8[%c0_16, %c0_17] : memref<640x128xi8, #tpu.memory_space<vmem>>, vector<640x128xi8>
    %29 = arith.sitofp %28 : vector<640x128xi8> to vector<640x128xf32>
    %30 = arith.truncf %29 : vector<640x128xf32> to vector<640x128xbf16>
    %cst_18 = arith.constant dense<0.000000e+00> : vector<8x128xf32>
    %31 = tpu.matmul %27, %30, %cst_18 {dimension_numbers = #tpu.dot_dimension_numbers<[1], [0], [0], [1], [0, 0, 1, 1], [], []>} : vector<8x640xbf16>, vector<640x128xbf16>, vector<8x128xf32> -> vector<8x128xf32>
    %c0_19 = arith.constant 0 : index
    %c0_20 = arith.constant 0 : index
    %32 = vector.load %arg9[%c0_19, %c0_20] : memref<1x128xf32, #tpu.memory_space<vmem>>, vector<1x128xf32>
    %33 = vector.broadcast %32 : vector<1x128xf32> to vector<8x128xf32>
    %34 = arith.mulf %31, %33 : vector<8x128xf32>
    %c0_21 = arith.constant 0 : index
    %c0_22 = arith.constant 0 : index
    %35 = vector.load %arg10[%c0_21, %c0_22] : memref<1x128xf32, #tpu.memory_space<vmem>>, vector<1x128xf32>
    %36 = vector.broadcast %35 : vector<1x128xf32> to vector<8x128xf32>
    %37 = arith.addf %34, %36 : vector<8x128xf32>
    %38 = math.tanh %37 : vector<8x128xf32>
    %c0_23 = arith.constant 0 : index
    %c0_24 = arith.constant 0 : index
    %39 = vector.load %arg11[%c0_23, %c0_24] : memref<8x128xf32, #tpu.memory_space<vmem>>, vector<8x128xf32>
    tpu.vector_store %arg11[%c0_23, %c0_24], %38 {strides = array<i32>} : memref<8x128xf32, #tpu.memory_space<vmem>>, vector<8x128xf32>,
    return
  }
  func.func @transform_0(%arg0: i32) -> (i32, i32) {
    %c0_i32 = arith.constant 0 : i32
    %c0_i32_0 = arith.constant 0 : i32
    return %arg0, %c0_i32 : i32, i32
  }
  func.func @transform_1(%arg0: i32) -> (i32, i32) {
    %c0_i32 = arith.constant 0 : i32
    %c0_i32_0 = arith.constant 0 : i32
    %c0_i32_1 = arith.constant 0 : i32
    return %c0_i32, %c0_i32_0 : i32, i32
  }
  func.func @transform_2(%arg0: i32) -> (i32, i32) {
    %c0_i32 = arith.constant 0 : i32
    %c0_i32_0 = arith.constant 0 : i32
    %c0_i32_1 = arith.constant 0 : i32
    return %c0_i32, %c0_i32_0 : i32, i32
  }
  func.func @transform_3(%arg0: i32) -> (i32, i32) {
    %c0_i32 = arith.constant 0 : i32
    %c0_i32_0 = arith.constant 0 : i32
    %c0_i32_1 = arith.constant 0 : i32
    return %c0_i32, %c0_i32_0 : i32, i32
  }
  func.func @transform_4(%arg0: i32) -> (i32, i32) {
    %c0_i32 = arith.constant 0 : i32
    %c0_i32_0 = arith.constant 0 : i32
    %c0_i32_1 = arith.constant 0 : i32
    return %c0_i32, %c0_i32_0 : i32, i32
  }
  func.func @transform_5(%arg0: i32) -> (i32, i32) {
    %c0_i32 = arith.constant 0 : i32
    %c0_i32_0 = arith.constant 0 : i32
    %c0_i32_1 = arith.constant 0 : i32
    return %c0_i32, %c0_i32_0 : i32, i32
  }
  func.func @transform_6(%arg0: i32) -> (i32, i32) {
    %c0_i32 = arith.constant 0 : i32
    %c0_i32_0 = arith.constant 0 : i32
    %c0_i32_1 = arith.constant 0 : i32
    return %c0_i32, %c0_i32_0 : i32, i32
  }
  func.func @transform_7(%arg0: i32) -> (i32, i32) {
    %c0_i32 = arith.constant 0 : i32
    %c0_i32_0 = arith.constant 0 : i32
    %c0_i32_1 = arith.constant 0 : i32
    return %c0_i32, %c0_i32_0 : i32, i32
  }
  func.func @transform_8(%arg0: i32) -> (i32, i32) {
    %c0_i32 = arith.constant 0 : i32
    %c0_i32_0 = arith.constant 0 : i32
    %c0_i32_1 = arith.constant 0 : i32
    return %c0_i32, %c0_i32_0 : i32, i32
  }
  func.func @transform_9(%arg0: i32) -> (i32, i32) {
    %c0_i32 = arith.constant 0 : i32
    %c0_i32_0 = arith.constant 0 : i32
    %c0_i32_1 = arith.constant 0 : i32
    return %c0_i32, %c0_i32_0 : i32, i32
  }
  func.func @transform_10(%arg0: i32) -> (i32, i32) {
    %c0_i32 = arith.constant 0 : i32
    %c0_i32_0 = arith.constant 0 : i32
    return %arg0, %c0_i32 : i32, i32
  }
}

</mosaic_0001>

<bundles_post_ra>
// kernel: tpu_custom_call.1
= control target key start
LH: loop header
LB: loop body
LE: loop exit
PB: predicated region body
PF: predicated region fallthrough
CT: control target
= control target key end

     0   :  { %15 = vsyncpa [#allocation3], 0  ;;  %s2271_s0 = inlined_call_operand.hbm [shape: f32[8,32], index: 0, kind: input, shape index: {}]   ;;  %s2272_s1 = inlined_call_operand.hbm [shape: s8[32,896], index: 1, kind: input, shape index: {}]   ;;  %s2273_s2 = inlined_call_operand.vmem [shape: f32[1,896], index: 2, kind: input, shape index: {}]   ;;  %s2274_s3 = inlined_call_operand.hbm [shape: f32[1,896], index: 3, kind: input, shape index: {}]   ;;  %s2275_s4 = inlined_call_operand.hbm [shape: s8[896,640], index: 4, kind: input, shape index: {}]   ;;  %s2276_s5 = inlined_call_operand.vmem [shape: f32[1,640], index: 5, kind: input, shape index: {}]   ;;  %s2277_s6 = inlined_call_operand.vmem [shape: f32[1,640], index: 6, kind: input, shape index: {}]   ;;  %s2278_s7 = inlined_call_operand.hbm [shape: s8[640,128], index: 7, kind: input, shape index: {}]   ;;  %s2279_s8 = inlined_call_operand.vmem [shape: f32[1,128], index: 8, kind: input, shape index: {}]   ;;  %s2280_s9 = inlined_call_operand.vmem [shape: f32[1,128], index: 9, kind: input, shape index: {}]   ;;  %s2281_s10 = inlined_call_operand.hbm [shape: f32[8,128], index: 10, kind: output, shape index: {}]  }
   0x1   :  { %16 = vsyncpa [#allocation6], 0 }
   0x2   :  { %17 = vsyncpa [#allocation9], 0 }
   0x3   :  { %18 = vsyncpa [#allocation4], 0  ;;  %s1952_s13 = smov [#allocation5]   ;;  %s1953_s15 = smov [#allocation8]  }
   0x4   :  { %s35_s14 = sshll.u32 %s1952_s13, 4  ;;  %s56_s16 = sshll.u32 %s1953_s15, 4  ;;  %s36_s14 = int_to_ptr.vmem [resolvable:$true] %s35_s14  ;;  %s2020_s16 = int_to_ptr.vmem [resolvable:$true] %s56_s16 }
   0x5   :  { %s1812_s19 = scalar_lea.hbm %s2272_s1, 896 }
   0x6   :  { %p1813_p0 = scmp.ne.s32.totalorder %s2272_s1, %s1812_s19  ;;  %p1816_p1 = scmp.lt.u32.totalorder %s1812_s19, %s2272_s1 }
   0x8   :  { %p1818_p2 = pnand %p1816_p1, %p1813_p0 }
   0xa   :  { %1821 = shalt.err (!%p1818_p2)
}
   0xb   :  { %s1822_s24 = scalar_lea.vmem %s36_s14, 896  ;;  %p1827_p4 = scmp.lt.s32.totalorder %s36_s14, %s36_s14 }
   0xc   :  { %p1823_p3 = scmp.ne.s32.totalorder %s36_s14, %s1822_s24  ;;  %p1828_p5 = scmp.lt.s32.totalorder %s1822_s24, %s1822_s24 }
   0xe   :  { %p1829_p6 = por %p1828_p5, %p1827_p4 }
  0x10   :  { %p1830_p7 = pnand %p1829_p6, %p1823_p3 }
  0x12   :  { %1833 = shalt.err (!%p1830_p7)
}
  0x13   :  { %38 = dma.hbm_to_vmem [thread:$0]  %s2272_s1, 896, %s36_s14, [#allocation6]  }
  0x14   :  { %s1834_s29 = scalar_lea.hbm %s2275_s4, 17920 }
  0x15   :  { %p1835_p8 = scmp.ne.s32.totalorder %s2275_s4, %s1834_s29  ;;  %p1838_p9 = scmp.lt.u32.totalorder %s1834_s29, %s2275_s4 }
  0x17   :  { %p1840_p10 = pnand %p1838_p9, %p1835_p8 }
  0x19   :  { %1843 = shalt.err (!%p1840_p10)
}
  0x1a   :  { %s1844_s15 = scalar_lea.vmem %s2020_s16, 17920  ;;  %p1849_p12 = scmp.lt.s32.totalorder %s2020_s16, %s2020_s16 }
  0x1b   :  { %p1845_p11 = scmp.ne.s32.totalorder %s2020_s16, %s1844_s15  ;;  %p1850_p13 = scmp.lt.s32.totalorder %s1844_s15, %s1844_s15 }
  0x1d   :  { %p1851_p0 = por %p1850_p13, %p1849_p12 }
  0x1f   :  { %p1852_p1 = pnand %p1851_p0, %p1845_p11 }
  0x21   :  { %1855 = shalt.err (!%p1852_p1)
}
  0x22   :  { %s1954_s1 = smov 640   ;;  %s1955_s14 = smov 40  }
  0x23   :  { %62 = dma.hbm_to_vmem [thread:$0]  %s2275_s4, 17920, %s2020_s16, [#allocation9], %s1954_s1, %s1954_s1, %s1955_s14  }
  0x24   :  { %s1956_s19 = smov [#allocation2]   ;;  %s1957_s21 = smov [#allocation7]  }
  0x25   :  { %s25_s20 = sshll.u32 %s1956_s19, 4  ;;  %s47_s22 = sshll.u32 %s1957_s21, 4  ;;  %s26_s20 = int_to_ptr.vmem [resolvable:$true] %s25_s20  ;;  %s48_s22 = int_to_ptr.vmem [resolvable:$true] %s47_s22 }
  0x26   :  { %s1856_s25 = scalar_lea.hbm %s2271_s0, 128 }
  0x27   :  { %p1857_p2 = scmp.ne.s32.totalorder %s2271_s0, %s1856_s25  ;;  %p1860_p3 = scmp.lt.u32.totalorder %s1856_s25, %s2271_s0 }
  0x29   :  { %p1862_p4 = pnand %p1860_p3, %p1857_p2 }
  0x2b   :  { %1865 = shalt.err (!%p1862_p4)
}
  0x2c   :  { %s1866_s4 = scalar_lea.vmem %s26_s20, 128  ;;  %p1871_p6 = scmp.lt.s32.totalorder %s26_s20, %s26_s20 }
  0x2d   :  { %p1867_p5 = scmp.ne.s32.totalorder %s26_s20, %s1866_s4  ;;  %p1872_p7 = scmp.lt.s32.totalorder %s1866_s4, %s1866_s4 }
  0x2f   :  { %p1873_p8 = por %p1872_p7, %p1871_p6 }
  0x31   :  { %p1874_p9 = pnand %p1873_p8, %p1867_p5 }
  0x33   :  { %1877 = shalt.err (!%p1874_p9)
}
  0x34   :  { %28 = dma.hbm_to_vmem [thread:$0]  %s2271_s0, 128, %s26_s20, [#allocation3]  }
  0x35   :  { %s1878_s13 = scalar_lea.hbm %s2274_s3, 112 }
  0x36   :  { %p1879_p10 = scmp.ne.s32.totalorder %s2274_s3, %s1878_s13  ;;  %p1882_p11 = scmp.lt.u32.totalorder %s1878_s13, %s2274_s3 }
  0x38   :  { %p1884_p12 = pnand %p1882_p11, %p1879_p10 }
  0x3a   :  { %1887 = shalt.err (!%p1884_p12)
}
  0x3b   :  { %s1888_s18 = scalar_lea.vmem %s48_s22, 112  ;;  %s1892_s19 = scalar_lea.vmem %s48_s22, 128 }
  0x3c   :  { %p1889_p13 = scmp.ne.s32.totalorder %s48_s22, %s1888_s18  ;;  %p1893_p0 = scmp.lt.s32.totalorder %s48_s22, %s48_s22 }
  0x3d   :  { %p1894_p1 = scmp.lt.s32.totalorder %s1892_s19, %s1888_s18 }
  0x3f   :  { %p1895_p2 = por %p1894_p1, %p1893_p0 }
  0x41   :  { %p1896_p3 = pnand %p1895_p2, %p1889_p13 }
  0x43   :  { %1899 = shalt.err (!%p1896_p3)
}
  0x44   :  { %50 = dma.hbm_to_vmem [thread:$0]  %s2274_s3, 112, %s48_s22, [#allocation6]  }
  0x45   :  { %s1958_s21 = smov [#allocation10]   ;;  %s1900_s26 = scalar_lea.hbm %s2278_s7, 2560 }
  0x46   :  { %s72_s23 = sshll.u32 %s1958_s21, 4  ;;  %p1901_p4 = scmp.ne.s32.totalorder %s2278_s7, %s1900_s26  ;;  %s73_s23 = int_to_ptr.vmem [resolvable:$true] %s72_s23 }
  0x47   :  { %p1904_p5 = scmp.lt.u32.totalorder %s1900_s26, %s2278_s7 }
  0x49   :  { %p1906_p6 = pnand %p1904_p5, %p1901_p4 }
  0x4b   :  { %1909 = shalt.err (!%p1906_p6)
}
  0x4c   :  { %s1910_s16 = scalar_lea.vmem %s73_s23, 2560  ;;  %p1915_p8 = scmp.lt.s32.totalorder %s73_s23, %s73_s23 }
  0x4d   :  { %p1911_p7 = scmp.ne.s32.totalorder %s73_s23, %s1910_s16  ;;  %p1916_p9 = scmp.lt.s32.totalorder %s1910_s16, %s1910_s16 }
  0x4f   :  { %p1917_p10 = por %p1916_p9, %p1915_p8 }
  0x51   :  { %p1918_p11 = pnand %p1917_p10, %p1911_p7 }
  0x53   :  { %1921 = shalt.err (!%p1918_p11)
}
  0x54   :  { %s1959_s3 = smov 128   ;;  %s1960_s22 = smov 8  }
  0x55   :  { %78 = dma.hbm_to_vmem [thread:$0]  %s2278_s7, 2560, %s73_s23, [#allocation9], %s1959_s3, %s1959_s3, %s1960_s22  }
  0x56   :  { %1944 = dma.done.wait [#allocation3], 128  }
  0x57   :  { %1945 = vsyncadd [#allocation3], 4294967168 }
  0x58   :  { %1946 = dma.done.wait [#allocation6], 1008  }
  0x59   :  { %1947 = vsyncadd [#allocation6], 4294966288 }
  0x5a   :  { %1948 = dma.done.wait [#allocation9], 20480  }
  0x5b   :  { %1949 = vsyncadd [#allocation9], 4294946816  ;;  %v1961_v0 = vmov 0   ;;  %v102_v1 = vld [vmem:[#allocation5 + $0x8] sm:$0xff]  ;;  %v101_v2 = vld [vmem:[#allocation5] sm:$0xff]  ;;  %vm122_vm0 = vcmask 261120  }
  0x5c   :  { %158 = vmatprep.mubr.bf16.mxu1 %v1961_v0  ;;  %v109_v3 = vunpack.c.l.s8.bf16 %v102_v1  ;;  %v116_v4 = vunpack.c.h.s8.bf16 %v102_v1  ;;  %v108_v5 = vunpack.c.l.s8.bf16 %v101_v2  ;;  %v104_v6 = vld [vmem:[#allocation5 + $0x18] sm:$0xff]  ;;  %v392_v7 = vld [vmem:[#allocation8 + $0x8] sm:$0xff]  ;;  %v391_v8 = vld [vmem:[#allocation8] sm:$0xff]  ;;  %v115_v9 = vunpack.c.h.s8.bf16 %v101_v2  ;;  %s1964_s18 = smov [#allocation11]  }
  0x5d   :  { %v99_v10 = vld [vmem:[#allocation2] sm:$0xff]  ;;  %v532_v11 = vunpack.c.l.s8.bf16 %v392_v7  ;;  %v111_v12 = vunpack.c.l.s8.bf16 %v104_v6  ;;  %v103_v13 = vld [vmem:[#allocation5 + $0x10] sm:$0xff]  ;;  %v537_v14 = vunpack.c.h.s8.bf16 %v392_v7  ;;  %v531_v15 = vunpack.c.l.s8.bf16 %v391_v8  ;;  %v396_v20 = vld [vmem:[#allocation8 + $0x28] sm:$0xff]  ;;  %s1577_s19 = sshll.u32 %s1964_s18, 4  ;;  %s1578_s19 = int_to_ptr.vmem [resolvable:$true] %s1577_s19 }
  0x5e   :  { %126 = vmatprep.subr.bf16.mxu1 %v109_v3  ;;  %v397_v16 = vld [vmem:[#allocation8 + $0x30] sm:$0xff]  ;;  %v2088_v17 = vpack.c.bf16 %v99_v10, %v99_v10  ;;  %v536_v18 = vunpack.c.h.s8.bf16 %v391_v8  ;;  %v110_v19 = vunpack.c.l.s8.bf16 %v103_v13  ;;  %v118_v21 = vunpack.c.h.s8.bf16 %v104_v6  ;;  %v106_v23 = vld [vmem:[#allocation5 + $0x28] sm:$0xff]  ;;  %v105_v28 = vld [vmem:[#allocation5 + $0x20] sm:$0xff]  ;;  %s1922_s0 = scalar_lea.vmem %s1578_s19, 128  ;;  %p1927_p13 = scmp.lt.s32.totalorder %s1578_s19, %s1578_s19 }
  0x5f   :  { %127 = vmatpush1.bf16.msra.mxu1 %v108_v5  ;;  %811 = vmatprep.subr.bf16.mxu0 %v532_v11  ;;  %v542_v22 = vunpack.c.l.s8.bf16 %v397_v16  ;;  %v541_v24 = vunpack.c.l.s8.bf16 %v396_v20  ;;  %v117_v25 = vunpack.c.h.s8.bf16 %v103_v13  ;;  %v547_v26 = vunpack.c.h.s8.bf16 %v397_v16  ;;  %v402_v29 = vld [vmem:[#allocation8 + $0x58] sm:$0xff]  ;;  %v401_v32 = vld [vmem:[#allocation8 + $0x50] sm:$0xff]  ;;  %v407_v39 = vld [vmem:[#allocation8 + $0x80] sm:$0xff]  ;;  %p1923_p12 = scmp.ne.s32.totalorder %s1578_s19, %s1922_s0  ;;  %p1928_p0 = scmp.lt.s32.totalorder %s1922_s0, %s1922_s0 }
  0x60   :  { %128 = vmatprep.subr.bf16.mxu1 %v116_v4  ;;  %812 = vmatpush1.bf16.msra.mxu0 %v531_v15  ;;  %v113_v27 = vunpack.c.l.s8.bf16 %v106_v23  ;;  %v546_v30 = vunpack.c.h.s8.bf16 %v396_v20  ;;  %v112_v31 = vunpack.c.l.s8.bf16 %v105_v28  ;;  %v120_v33 = vunpack.c.h.s8.bf16 %v106_v23  ;;  %v107_v38 = vld [vmem:[#allocation5 + $0x30] sm:$0xff]  ;;  %v406_v42 = vld [vmem:[#allocation8 + $0x78] sm:$0xff]  ;;  %v412_v51 = vld [vmem:[#allocation8 + $0xa8] sm:$0xff] }
  0x61   :  { %813 = vmatprep.subr.bf16.mxu0 %v537_v14  ;;  %v552_v34 = vunpack.c.l.s8.bf16 %v402_v29  ;;  %v551_v35 = vunpack.c.l.s8.bf16 %v401_v32  ;;  %v119_v36 = vunpack.c.h.s8.bf16 %v105_v28  ;;  %v557_v37 = vunpack.c.h.s8.bf16 %v402_v29  ;;  %v394_v45 = vld [vmem:[#allocation8 + $0x18] sm:$0xff]  ;;  %v393_v50 = vld [vmem:[#allocation8 + $0x10] sm:$0xff]  ;;  %v411_v55 = vld [vmem:[#allocation8 + $0xa0] sm:$0xff]  ;;  %p1929_p1 = por %p1928_p0, %p1927_p13 }
  0x62   :  { %v556_v40 = vunpack.c.h.s8.bf16 %v401_v32  ;;  %v114_v41 = vunpack.c.l.s8.bf16 %v107_v38  ;;  %v1962_v43 = vmov 0.0   ;;  %v562_v44 = vunpack.c.l.s8.bf16 %v407_v39  ;;  %v399_v57 = vld [vmem:[#allocation8 + $0x40] sm:$0xff]  ;;  %v398_v62 = vld [vmem:[#allocation8 + $0x38] sm:$0xff]  ;;  %v417_v63 = vld [vmem:[#allocation8 + $0xd0] sm:$0xff] }
  0x63   :  { %129 = vmatpush1.bf16.msra.mxu1 %v115_v9  ;;  %v561_v46 = vunpack.c.l.s8.bf16 %v406_v42  ;;  %v121_v47 = vunpack.c.h.s8.bf16 %v107_v38  ;;  %vm1963_vm1 = vmmov 0   ;;  %v567_v48 = vunpack.c.h.s8.bf16 %v407_v39  ;;  %v416_v4 = vld [vmem:[#allocation8 + $0xc8] sm:$0xff]  ;;  %v403_v11 = vld [vmem:[#allocation8 + $0x60] sm:$0xff]  ;;  %v421_v16 = vld [vmem:[#allocation8 + $0xf0] sm:$0xff]  ;;  %p1930_p2 = pnand %p1929_p1, %p1923_p12 }
  0x64   :  { %167 = vmatprep.subr.bf16.mxu1 %v111_v12  ;;  %814 = vmatpush1.bf16.msra.mxu0 %v536_v18  ;;  %v534_v49 = vunpack.c.l.s8.bf16 %v394_v45  ;;  %v566_v52 = vunpack.c.h.s8.bf16 %v406_v42  ;;  %v533_v53 = vunpack.c.l.s8.bf16 %v393_v50  ;;  %v572_v54 = vunpack.c.l.s8.bf16 %v412_v51  ;;  %v404_v6 = vld [vmem:[#allocation8 + $0x68] sm:$0xff]  ;;  %v422_v12 = vld [vmem:[#allocation8 + $0xf8] sm:$0xff]  ;;  %v409_v18 = vld [vmem:[#allocation8 + $0x90] sm:$0xff] }
  0x65   :  { %815 = vmatprep.subr.bf16.mxu0 %v542_v22  ;;  %v539_v56 = vunpack.c.h.s8.bf16 %v394_v45  ;;  %v571_v58 = vunpack.c.l.s8.bf16 %v411_v55  ;;  %v538_v59 = vunpack.c.h.s8.bf16 %v393_v50  ;;  %v577_v60 = vunpack.c.h.s8.bf16 %v412_v51  ;;  %v408_v23 = vld [vmem:[#allocation8 + $0x88] sm:$0xff]  ;;  %v423_v42 = vld [vmem:[#allocation8 + $0x100] sm:$0xff]  ;;  %v426_v51 = vld [vmem:[#allocation8 + $0x118] sm:$0xff] }
  0x66   :  { %1588 = vmatmul.mubr.msk.bf16.vlgmr.msra.gmra.mrb[0].mxu1 %vm122_vm0, %v2088_v17  ;;  %v544_v61 = vunpack.c.l.s8.bf16 %v399_v57  ;;  %v576_v1 = vunpack.c.h.s8.bf16 %v411_v55  ;;  %v543_v2 = vunpack.c.l.s8.bf16 %v398_v62  ;;  %v582_v3 = vunpack.c.l.s8.bf16 %v417_v63  ;;  %v424_v39 = vld [vmem:[#allocation8 + $0x108] sm:$0xff] }
  0x67   :  { %168 = vmatpush1.bf16.msra.mxu1 %v110_v19  ;;  %199 = vmatprep.mubr.bf16.mxu1 %v1961_v0  ;;  %v549_v5 = vunpack.c.h.s8.bf16 %v399_v57  ;;  %v581_v7 = vunpack.c.l.s8.bf16 %v416_v4  ;;  %v548_v8 = vunpack.c.h.s8.bf16 %v398_v62  ;;  %v587_v9 = vunpack.c.h.s8.bf16 %v417_v63 }
  0x68   :  { %169 = vmatprep.subr.bf16.mxu1 %v118_v21  ;;  %816 = vmatpush1.bf16.msra.mxu0 %v541_v24  ;;  %v554_v10 = vunpack.c.l.s8.bf16 %v404_v6  ;;  %v586_v13 = vunpack.c.h.s8.bf16 %v416_v4  ;;  %v553_v14 = vunpack.c.l.s8.bf16 %v403_v11  ;;  %v592_v15 = vunpack.c.l.s8.bf16 %v422_v12 }
  0x69   :  { %817 = vmatprep.subr.bf16.mxu0 %v547_v26  ;;  %v591_v19 = vunpack.c.l.s8.bf16 %v421_v16  ;;  %v558_v20 = vunpack.c.h.s8.bf16 %v403_v11  ;;  %v597_v21 = vunpack.c.h.s8.bf16 %v422_v12  ;;  %v564_v22 = vunpack.c.l.s8.bf16 %v409_v18 }
  0x6a   :  { %v596_v24 = vunpack.c.h.s8.bf16 %v421_v16  ;;  %v569_v26 = vunpack.c.h.s8.bf16 %v409_v18  ;;  %v568_v28 = vunpack.c.h.s8.bf16 %v408_v23  ;;  %v599_v45 = vunpack.c.h.s8.bf16 %v424_v39 }
  0x6b   :  { %170 = vmatpush1.bf16.msra.mxu1 %v117_v25  ;;  %v563_v25 = vunpack.c.l.s8.bf16 %v408_v23  ;;  %v606_v57 = vunpack.c.h.s8.bf16 %v426_v51  ;;  %v291_v63 = vlaneseq }
  0x6c   :  { %208 = vmatprep.subr.bf16.mxu1 %v113_v27  ;;  %818 = vmatpush1.bf16.msra.mxu0 %v546_v30  ;;  %v414_v27 = vld [vmem:[#allocation8 + $0xb8] sm:$0xff]  ;;  %v413_v30 = vld [vmem:[#allocation8 + $0xb0] sm:$0xff] }
  0x6d   :  { %819 = vmatprep.subr.bf16.mxu0 %v552_v34  ;;  %v574_v29 = vunpack.c.l.s8.bf16 %v414_v27  ;;  %v579_v32 = vunpack.c.h.s8.bf16 %v414_v27  ;;  %v578_v34 = vunpack.c.h.s8.bf16 %v413_v30 }
  0x6e   :  { %1589 = vmatmul.mubr.msk.bf16.vlgmr.msra.gmra.mrb[4].mxu1 %vm122_vm0, %v2088_v17 }
  0x6f   :  { %209 = vmatpush1.bf16.msra.mxu1 %v112_v31  ;;  %240 = vmatprep.mubr.bf16.mxu1 %v1961_v0  ;;  %v573_v31 = vunpack.c.l.s8.bf16 %v413_v30 }
  0x70   :  { %210 = vmatprep.subr.bf16.mxu1 %v120_v33  ;;  %820 = vmatpush1.bf16.msra.mxu0 %v551_v35  ;;  %v419_v33 = vld [vmem:[#allocation8 + $0xe0] sm:$0xff] }
  0x71   :  { %821 = vmatprep.subr.bf16.mxu0 %v557_v37  ;;  %v584_v35 = vunpack.c.l.s8.bf16 %v419_v33  ;;  %v589_v38 = vunpack.c.h.s8.bf16 %v419_v33  ;;  %v437_v33 = vld [vmem:[#allocation8 + $0x170] sm:$0xff] }
  0x73   :  { %211 = vmatpush1.bf16.msra.mxu1 %v119_v36  ;;  %v418_v36 = vld [vmem:[#allocation8 + $0xd8] sm:$0xff] }
  0x74   :  { %1725 = vmatprep.subr.bf16.mxu1 %v1962_v43  ;;  %822 = vmatpush1.bf16.msra.mxu0 %v556_v40  ;;  %v583_v37 = vunpack.c.l.s8.bf16 %v418_v36  ;;  %v588_v40 = vunpack.c.h.s8.bf16 %v418_v36 }
  0x75   :  { %823 = vmatprep.subr.bf16.mxu0 %v562_v44  ;;  %v593_v44 = vunpack.c.l.s8.bf16 %v423_v42 }
  0x76   :  { %1590 = vmatmul.mubr.msk.bf16.vlgmr.msra.gmra.mrb[8].mxu1 %vm122_vm0, %v2088_v17 }
  0x77   :  { %1726 = vmatpush3.bf16.msra.mxu1 %v114_v41  ;;  %1729 = vmatprep.mubr.msk.bf16.mxu1 %vm1963_vm1, %v1962_v43  ;;  %v594_v41 = vunpack.c.l.s8.bf16 %v424_v39 }
  0x78   :  { %1727 = vmatprep.subr.bf16.mxu1 %v1962_v43  ;;  %824 = vmatpush1.bf16.msra.mxu0 %v561_v46  ;;  %v598_v46 = vunpack.c.h.s8.bf16 %v423_v42 }
  0x79   :  { %825 = vmatprep.subr.bf16.mxu0 %v567_v48  ;;  %v429_v48 = vld [vmem:[#allocation8 + $0x130] sm:$0xff] }
  0x7a   :  { %v604_v50 = vunpack.c.l.s8.bf16 %v429_v48 }
  0x7b   :  { %1728 = vmatpush3.bf16.msra.mxu1 %v121_v47  ;;  %v427_v47 = vld [vmem:[#allocation8 + $0x120] sm:$0xff] }
  0x7c   :  { %975 = vmatprep.subr.bf16.mxu1 %v534_v49  ;;  %826 = vmatpush1.bf16.msra.mxu0 %v566_v52  ;;  %v602_v49 = vunpack.c.l.s8.bf16 %v427_v47  ;;  %v428_v52 = vld [vmem:[#allocation8 + $0x128] sm:$0xff]  ;;  %v607_v55 = vunpack.c.h.s8.bf16 %v427_v47 }
  0x7d   :  { %827 = vmatprep.subr.bf16.mxu0 %v572_v54  ;;  %v603_v54 = vunpack.c.l.s8.bf16 %v428_v52 }
  0x7e   :  { %1730 = vmatmul.mubr.msk.bf16.vlgmr.msra.gmra.mrb[12].mxu1 %vm122_vm0, %v2088_v17  ;;  %v559_v17 = vunpack.c.h.s8.bf16 %v404_v6 }
  0x7f   :  { %976 = vmatpush1.bf16.msra.mxu1 %v533_v53  ;;  %v601_v53 = vunpack.c.l.s8.bf16 %v426_v51  ;;  %v627_v51 = vunpack.c.h.s8.bf16 %v437_v33 }
  0x80   :  { %977 = vmatprep.subr.bf16.mxu1 %v539_v56  ;;  %828 = vmatpush1.bf16.msra.mxu0 %v571_v58  ;;  %v609_v56 = vunpack.c.h.s8.bf16 %v429_v48  ;;  %v608_v58 = vunpack.c.h.s8.bf16 %v428_v52 }
  0x81   :  { %829 = vmatprep.subr.bf16.mxu0 %v577_v60  ;;  %v434_v60 = vld [vmem:[#allocation8 + $0x158] sm:$0xff] }
  0x82   :  { %v614_v62 = vunpack.c.l.s8.bf16 %v434_v60 }
  0x83   :  { %978 = vmatpush1.bf16.msra.mxu1 %v538_v59  ;;  %v432_v59 = vld [vmem:[#allocation8 + $0x148] sm:$0xff] }
  0x84   :  { %979 = vmatprep.subr.bf16.mxu1 %v544_v61  ;;  %830 = vmatpush1.bf16.msra.mxu0 %v576_v1  ;;  %v612_v61 = vunpack.c.l.s8.bf16 %v432_v59  ;;  %v2104_v1 = vshrl.u32 %v291_v63, 7  ;;  %v617_v30 = vunpack.c.h.s8.bf16 %v432_v59  ;;  %v443_v63 = vld [vmem:[#allocation8 + $0x1a0] sm:$0xff] }
  0x85   :  { %831 = vmatprep.subr.bf16.mxu0 %v582_v3  ;;  %v2112_v3 = vld [vmem:[%s2273_s2] sm:$0xff] }
  0x86   :  { %v2115_v4 = vsub.s32 1, %v2104_v1 }
  0x87   :  { %980 = vmatpush1.bf16.msra.mxu1 %v543_v2  ;;  %v2107_v2 = vsub.s32 0, %v2104_v1 }
  0x88   :  { %981 = vmatprep.subr.bf16.mxu1 %v549_v5  ;;  %832 = vmatpush1.bf16.msra.mxu0 %v581_v7  ;;  %v2117_v5 = vld [vmem:[#allocation7] sm:$0xff]  ;;  %v298_v7 = vrot.slane %v2112_v3, %v2115_v4 }
  0x89   :  { %833 = vmatprep.subr.bf16.mxu0 %v587_v9  ;;  %v294_v6 = vrot.slane %v2112_v3, %v2107_v2 }
  0x8b   :  { %982 = vmatpush1.bf16.msra.mxu1 %v548_v8  ;;  %v338_v8 = vrot.slane %v2117_v5, %v2107_v2 }
  0x8c   :  { %983 = vmatprep.subr.bf16.mxu1 %v554_v10  ;;  %834 = vmatpush1.bf16.msra.mxu0 %v586_v13  ;;  %v342_v10 = vrot.slane %v2117_v5, %v2115_v4 }
  0x8d   :  { %835 = vmatprep.subr.bf16.mxu0 %v592_v15  ;;  %v2128_v15 = vsub.s32 3, %v2104_v1 }
  0x8f   :  { %984 = vmatpush1.bf16.msra.mxu1 %v553_v14  ;;  %v306_v23 = vrot.slane %v2112_v3, %v2128_v15 }
  0x90   :  { %985 = vmatprep.subr.bf16.mxu1 %v559_v17  ;;  %836 = vmatpush1.bf16.msra.mxu0 %v591_v19 }
  0x91   :  { %837 = vmatprep.subr.bf16.mxu0 %v597_v21  ;;  %v433_v21 = vld [vmem:[#allocation8 + $0x150] sm:$0xff] }
  0x92   :  { %v618_v39 = vunpack.c.h.s8.bf16 %v433_v21 }
  0x93   :  { %986 = vmatpush1.bf16.msra.mxu1 %v558_v20  ;;  %v431_v20 = vld [vmem:[#allocation8 + $0x140] sm:$0xff] }
  0x94   :  { %987 = vmatprep.subr.bf16.mxu1 %v564_v22  ;;  %838 = vmatpush1.bf16.msra.mxu0 %v596_v24 }
  0x95   :  { %839 = vmatprep.subr.bf16.mxu0 %v602_v49 }
  0x97   :  { %988 = vmatpush1.bf16.msra.mxu1 %v563_v25  ;;  %v611_v25 = vunpack.c.l.s8.bf16 %v431_v20 }
  0x98   :  { %989 = vmatprep.subr.bf16.mxu1 %v569_v26  ;;  %840 = vmatpush1.bf16.msra.mxu0 %v601_v53  ;;  %v613_v26 = vunpack.c.l.s8.bf16 %v433_v21 }
  0x99   :  { %841 = vmatprep.subr.bf16.mxu0 %v607_v55  ;;  %v444_v55 = vld [vmem:[#allocation8 + $0x1a8] sm:$0xff] }
  0x9b   :  { %990 = vmatpush1.bf16.msra.mxu1 %v568_v28  ;;  %v350_v28 = vrot.slane %v2117_v5, %v2128_v15 }
  0x9c   :  { %991 = vmatprep.subr.bf16.mxu1 %v574_v29  ;;  %842 = vmatpush1.bf16.msra.mxu0 %v606_v57 }
  0x9d   :  { %852 = vmatprep.subr.bf16.mxu0 %v612_v61  ;;  %v634_v61 = vunpack.c.l.s8.bf16 %v444_v55 }
  0x9f   :  { %992 = vmatpush1.bf16.msra.mxu1 %v573_v31  ;;  %v619_v31 = vunpack.c.h.s8.bf16 %v434_v60 }
  0xa0   :  { %993 = vmatprep.subr.bf16.mxu1 %v579_v32 }
  0xa3   :  { %994 = vmatpush1.bf16.msra.mxu1 %v578_v34  ;;  %v439_v34 = vld [vmem:[#allocation8 + $0x180] sm:$0xff] }
  0xa4   :  { %995 = vmatprep.subr.bf16.mxu1 %v584_v35  ;;  %v624_v42 = vunpack.c.l.s8.bf16 %v439_v34  ;;  %v629_v52 = vunpack.c.h.s8.bf16 %v439_v34 }
  0xa7   :  { %996 = vmatpush1.bf16.msra.mxu1 %v583_v37 }
  0xa8   :  { %997 = vmatprep.subr.bf16.mxu1 %v589_v38  ;;  %v616_v38 = vunpack.c.h.s8.bf16 %v431_v20 }
  0xab   :  { %998 = vmatpush1.bf16.msra.mxu1 %v588_v40 }
  0xac   :  { %999 = vmatprep.subr.bf16.mxu1 %v594_v41  ;;  %v622_v41 = vunpack.c.l.s8.bf16 %v437_v33 }
  0xaf   :  { %1000 = vmatpush1.bf16.msra.mxu1 %v593_v44  ;;  %v436_v44 = vld [vmem:[#allocation8 + $0x168] sm:$0xff] }
  0xb0   :  { %1001 = vmatprep.subr.bf16.mxu1 %v599_v45  ;;  %v438_v45 = vld [vmem:[#allocation8 + $0x178] sm:$0xff]  ;;  %v621_v47 = vunpack.c.l.s8.bf16 %v436_v44 }
  0xb1   :  { %v623_v48 = vunpack.c.l.s8.bf16 %v438_v45  ;;  %v628_v59 = vunpack.c.h.s8.bf16 %v438_v45 }
  0xb3   :  { %1002 = vmatpush1.bf16.msra.mxu1 %v598_v46 }
  0xb4   :  { %1003 = vmatprep.subr.bf16.mxu1 %v604_v50 }
  0xb7   :  { %1004 = vmatpush1.bf16.msra.mxu1 %v603_v54  ;;  %v442_v54 = vld [vmem:[#allocation8 + $0x198] sm:$0xff] }
  0xb8   :  { %1005 = vmatprep.subr.bf16.mxu1 %v609_v56  ;;  %v632_v60 = vunpack.c.l.s8.bf16 %v442_v54 }
  0xbb   :  { %1006 = vmatpush1.bf16.msra.mxu1 %v608_v58  ;;  %v626_v58 = vunpack.c.h.s8.bf16 %v436_v44  ;;  %v459_v44 = vld [vmem:[#allocation8 + $0x220] sm:$0xff] }
  0xbc   :  { %1016 = vmatprep.subr.bf16.mxu1 %v614_v62  ;;  %v441_v62 = vld [vmem:[#allocation8 + $0x190] sm:$0xff] }
 0x139   :  { %v160_v9 = vpop.f32.mrb[0].mxu1 }
 0x13a   :  { %v326_v11 = vmul.f32 %v294_v6, %v160_v9  ;;  %v162_v12 = vpop.f32.mrb[1].mxu1  ;;  %v631_v6 = vunpack.c.l.s8.bf16 %v441_v62  ;;  %v639_v9 = vunpack.c.h.s8.bf16 %v444_v55 }
 0x13b   :  { %v327_v13 = vmul.f32 %v298_v7, %v162_v12  ;;  %v164_v14 = vpop.f32.mrb[2].mxu1  ;;  %v633_v7 = vunpack.c.l.s8.bf16 %v443_v63  ;;  %v636_v12 = vunpack.c.h.s8.bf16 %v441_v62 }
 0x13c   :  { %v370_v16 = vadd.f32 %v338_v8, %v326_v11  ;;  %v165_v17 = vpop.f32.mrb[3].mxu1  ;;  %v637_v8 = vunpack.c.h.s8.bf16 %v442_v54  ;;  %v449_v11 = vld [vmem:[#allocation8 + $0x1d0] sm:$0xff] }
 0x13d   :  { %v371_v18 = vadd.f32 %v342_v10, %v327_v13  ;;  %v447_v10 = vld [vmem:[#allocation8 + $0x1c0] sm:$0xff]  ;;  %v638_v13 = vunpack.c.h.s8.bf16 %v443_v63  ;;  %v446_v17 = vld [vmem:[#allocation8 + $0x1b8] sm:$0xff] }
 0x13e   :  { %v377_v19 = vmax.f32 %v370_v16, 0.0  ;;  %v642_v14 = vunpack.c.l.s8.bf16 %v447_v10  ;;  %v644_v16 = vunpack.c.l.s8.bf16 %v449_v11 }
 0x13f   :  { %v378_v22 = vmax.f32 %v371_v18, 0.0  ;;  %v448_v18 = vld [vmem:[#allocation8 + $0x1c8] sm:$0xff] }
 0x140   :  { %v2138_v29 = vpack.c.bf16 %v377_v19, %v377_v19  ;;  %v648_v33 = vunpack.c.h.s8.bf16 %v448_v18 }
 0x141   :  { %v2132_v24 = vpack.c.bf16 %v378_v22, %v378_v22  ;;  %v2134_v27 = vpop.f32.mrb[4].mxu1  ;;  %v641_v22 = vunpack.c.l.s8.bf16 %v446_v17 }
 0x142   :  { %v203_v32 = vpop.f32.mrb[5].mxu1 }
 0x143   :  { %843 = vmatprep.mubr.bf16.mxu0 %v2132_v24  ;;  %1007 = vmatprep.mubr.bf16.mxu1 %v2132_v24  ;;  %v329_v35 = vmul.f32 %v306_v23, %v203_v32  ;;  %v205_v36 = vpop.f32.mrb[6].mxu1  ;;  %v643_v23 = vunpack.c.l.s8.bf16 %v448_v18  ;;  %v646_v32 = vunpack.c.h.s8.bf16 %v446_v17  ;;  %v469_v17 = vld [vmem:[#allocation8 + $0x270] sm:$0xff] }
 0x144   :  { %844 = vmatmul.mubr.bf16.vlgmr.msra.gmra.mrb[0].mxu0 %v2138_v29  ;;  %1008 = vmatmul.mubr.bf16.vlgmr.msra.gmra.mrb[16].mxu1 %v2138_v29  ;;  %v206_v37 = vpop.f32.mrb[7].mxu1  ;;  %v451_v36 = vld [vmem:[#allocation8 + $0x1e0] sm:$0xff] }
 0x145   :  { %853 = vmatpush1.bf16.msra.mxu0 %v611_v25  ;;  %1017 = vmatpush1.bf16.msra.mxu1 %v613_v26  ;;  %v373_v40 = vadd.f32 %v350_v28, %v329_v35  ;;  %v647_v26 = vunpack.c.h.s8.bf16 %v447_v10  ;;  %v649_v28 = vunpack.c.h.s8.bf16 %v449_v11  ;;  %v453_v37 = vld [vmem:[#allocation8 + $0x1f0] sm:$0xff]  ;;  %v656_v45 = vunpack.c.h.s8.bf16 %v451_v36 }
 0x146   :  { %854 = vmatprep.subr.bf16.mxu0 %v617_v30  ;;  %1018 = vmatprep.subr.bf16.mxu1 %v619_v31  ;;  %v452_v30 = vld [vmem:[#allocation8 + $0x1e8] sm:$0xff]  ;;  %v454_v31 = vld [vmem:[#allocation8 + $0x1f8] sm:$0xff] }
 0x147   :  { %v380_v46 = vmax.f32 %v373_v40, 0.0  ;;  %v652_v34 = vunpack.c.l.s8.bf16 %v452_v30  ;;  %v654_v35 = vunpack.c.l.s8.bf16 %v454_v31  ;;  %v657_v40 = vunpack.c.h.s8.bf16 %v452_v30  ;;  %v468_v30 = vld [vmem:[#allocation8 + $0x268] sm:$0xff] }
 0x149   :  { %855 = vmatpush1.bf16.msra.mxu0 %v616_v38  ;;  %1019 = vmatpush1.bf16.msra.mxu1 %v618_v39  ;;  %v2144_v49 = vpack.c.bf16 %v380_v46, %v380_v46  ;;  %v2146_v50 = vpop.f32.mrb[8].mxu1  ;;  %v651_v38 = vunpack.c.l.s8.bf16 %v451_v36  ;;  %v653_v39 = vunpack.c.l.s8.bf16 %v453_v37  ;;  %v658_v46 = vunpack.c.h.s8.bf16 %v453_v37  ;;  %v472_v37 = vld [vmem:[#allocation8 + $0x288] sm:$0xff] }
 0x14a   :  { %856 = vmatprep.subr.bf16.mxu0 %v622_v41  ;;  %1020 = vmatprep.subr.bf16.mxu1 %v624_v42  ;;  %v2148_v53 = vpop.f32.mrb[9].mxu1  ;;  %v659_v41 = vunpack.c.h.s8.bf16 %v454_v31  ;;  %v457_v42 = vld [vmem:[#allocation8 + $0x210] sm:$0xff]  ;;  %v689_v36 = vunpack.c.h.s8.bf16 %v469_v17 }
 0x14b   :  { %884 = vmatprep.mubr.bf16.mxu0 %v2144_v49  ;;  %1048 = vmatprep.mubr.bf16.mxu1 %v2144_v49  ;;  %v246_v56 = vpop.f32.mrb[10].mxu1 }
 0x14c   :  { %v247_v57 = vpop.f32.mrb[11].mxu1  ;;  %v667_v56 = vunpack.c.h.s8.bf16 %v457_v42 }
 0x14d   :  { %857 = vmatpush1.bf16.msra.mxu0 %v621_v47  ;;  %1021 = vmatpush1.bf16.msra.mxu1 %v623_v48  ;;  %v662_v47 = vunpack.c.l.s8.bf16 %v457_v42  ;;  %v664_v48 = vunpack.c.l.s8.bf16 %v459_v44  ;;  %v669_v57 = vunpack.c.h.s8.bf16 %v459_v44  ;;  %v688_v42 = vunpack.c.h.s8.bf16 %v468_v30 }
 0x14e   :  { %858 = vmatprep.subr.bf16.mxu0 %v627_v51  ;;  %1022 = vmatprep.subr.bf16.mxu1 %v629_v52  ;;  %v456_v51 = vld [vmem:[#allocation8 + $0x208] sm:$0xff]  ;;  %v458_v52 = vld [vmem:[#allocation8 + $0x218] sm:$0xff] }
 0x14f   :  { %v661_v54 = vunpack.c.l.s8.bf16 %v456_v51  ;;  %v663_v55 = vunpack.c.l.s8.bf16 %v458_v52  ;;  %v668_v62 = vunpack.c.h.s8.bf16 %v458_v52 }
 0x151   :  { %859 = vmatpush1.bf16.msra.mxu0 %v626_v58  ;;  %1023 = vmatpush1.bf16.msra.mxu1 %v628_v59  ;;  %v2152_v19 = vpop.f32.mrb[12].mxu1  ;;  %v462_v58 = vld [vmem:[#allocation8 + $0x238] sm:$0xff]  ;;  %v464_v59 = vld [vmem:[#allocation8 + $0x248] sm:$0xff] }
 0x152   :  { %860 = vmatprep.subr.bf16.mxu0 %v632_v60  ;;  %1024 = vmatprep.subr.bf16.mxu1 %v634_v61  ;;  %v1731_v20 = vpop.f32.mrb[13].mxu1  ;;  %v2155_v60 = vsub.s32 2, %v2104_v1  ;;  %v666_v61 = vunpack.c.h.s8.bf16 %v456_v51  ;;  %v672_v63 = vunpack.c.l.s8.bf16 %v462_v58 }
 0x153   :  { %v286_v21 = vpop.f32.mrb[14].mxu1 }
 0x154   :  { %v1732_v25 = vpop.f32.mrb[15].mxu1  ;;  %v302_v10 = vrot.slane %v2112_v3, %v2155_v60  ;;  %v346_v21 = vrot.slane %v2117_v5, %v2155_v60 }
 0x155   :  { %861 = vmatpush1.bf16.msra.mxu0 %v631_v6  ;;  %1025 = vmatpush1.bf16.msra.mxu1 %v633_v7  ;;  %v674_v6 = vunpack.c.l.s8.bf16 %v464_v59  ;;  %v461_v7 = vld [vmem:[#allocation8 + $0x230] sm:$0xff] }
 0x156   :  { %862 = vmatprep.subr.bf16.mxu0 %v637_v8  ;;  %1026 = vmatprep.subr.bf16.mxu1 %v639_v9  ;;  %v463_v8 = vld [vmem:[#allocation8 + $0x240] sm:$0xff]  ;;  %v313_v9 = vsub.s32 5, %v2104_v1  ;;  %v671_v11 = vunpack.c.l.s8.bf16 %v461_v7  ;;  %v328_v20 = vmul.f32 %v302_v10, %v2134_v27 }
 0x158   :  { %v314_v18 = vrot.slane %v2112_v3, %v313_v9 }
 0x159   :  { %863 = vmatpush1.bf16.msra.mxu0 %v636_v12  ;;  %1027 = vmatpush1.bf16.msra.mxu1 %v638_v13  ;;  %v673_v12 = vunpack.c.l.s8.bf16 %v463_v8  ;;  %v677_v13 = vunpack.c.h.s8.bf16 %v462_v58 }
 0x15a   :  { %864 = vmatprep.subr.bf16.mxu0 %v642_v14  ;;  %1028 = vmatprep.subr.bf16.mxu1 %v644_v16  ;;  %v679_v14 = vunpack.c.h.s8.bf16 %v464_v59  ;;  %v467_v16 = vld [vmem:[#allocation8 + $0x260] sm:$0xff]  ;;  %v331_v31 = vmul.f32 %v314_v18, %v2148_v53  ;;  %v692_v53 = vunpack.c.l.s8.bf16 %v472_v37 }
 0x15b   :  { %v682_v25 = vunpack.c.l.s8.bf16 %v467_v16 }
 0x15d   :  { %865 = vmatpush1.bf16.msra.mxu0 %v641_v22  ;;  %1029 = vmatpush1.bf16.msra.mxu1 %v643_v23  ;;  %v676_v22 = vunpack.c.h.s8.bf16 %v461_v7  ;;  %v678_v23 = vunpack.c.h.s8.bf16 %v463_v8  ;;  %v478_v7 = vld [vmem:[#allocation8 + $0x2b8] sm:$0xff] }
 0x15e   :  { %866 = vmatprep.subr.bf16.mxu0 %v647_v26  ;;  %1030 = vmatprep.subr.bf16.mxu1 %v649_v28  ;;  %v684_v26 = vunpack.c.l.s8.bf16 %v469_v17  ;;  %v466_v28 = vld [vmem:[#allocation8 + $0x258] sm:$0xff] }
 0x15f   :  { %v681_v27 = vunpack.c.l.s8.bf16 %v466_v28 }
 0x161   :  { %867 = vmatpush1.bf16.msra.mxu0 %v646_v32  ;;  %1031 = vmatpush1.bf16.msra.mxu1 %v648_v33  ;;  %v358_v32 = vrot.slane %v2117_v5, %v313_v9  ;;  %v372_v33 = vadd.f32 %v346_v21, %v328_v20  ;;  %v703_v9 = vunpack.c.l.s8.bf16 %v478_v7  ;;  %v481_v20 = vld [vmem:[#allocation8 + $0x2d0] sm:$0xff]  ;;  %v483_v21 = vld [vmem:[#allocation8 + $0x2e0] sm:$0xff] }
 0x162   :  { %868 = vmatprep.subr.bf16.mxu0 %v652_v34  ;;  %1032 = vmatprep.subr.bf16.mxu1 %v654_v35  ;;  %v683_v34 = vunpack.c.l.s8.bf16 %v468_v30  ;;  %v687_v35 = vunpack.c.h.s8.bf16 %v467_v16  ;;  %v708_v16 = vunpack.c.h.s8.bf16 %v478_v7  ;;  %v489_v30 = vld [vmem:[#allocation8 + $0x310] sm:$0xff]  ;;  %v498_v7 = vld [vmem:[#allocation8 + $0x358] sm:$0xff] }
 0x165   :  { %869 = vmatpush1.bf16.msra.mxu0 %v651_v38  ;;  %1033 = vmatpush1.bf16.msra.mxu1 %v653_v39  ;;  %v474_v38 = vld [vmem:[#allocation8 + $0x298] sm:$0xff]  ;;  %v375_v39 = vadd.f32 %v358_v32, %v331_v31  ;;  %v716_v31 = vunpack.c.h.s8.bf16 %v481_v20  ;;  %v718_v32 = vunpack.c.h.s8.bf16 %v483_v21 }
 0x166   :  { %870 = vmatprep.subr.bf16.mxu0 %v657_v40  ;;  %1034 = vmatprep.subr.bf16.mxu1 %v659_v41  ;;  %v379_v40 = vmax.f32 %v372_v33, 0.0  ;;  %v686_v41 = vunpack.c.h.s8.bf16 %v466_v28  ;;  %v694_v44 = vunpack.c.l.s8.bf16 %v474_v38  ;;  %v487_v28 = vld [vmem:[#allocation8 + $0x300] sm:$0xff] }
 0x167   :  { %v722_v33 = vunpack.c.l.s8.bf16 %v487_v28 }
 0x169   :  { %871 = vmatpush1.bf16.msra.mxu0 %v656_v45  ;;  %1035 = vmatpush1.bf16.msra.mxu1 %v658_v46  ;;  %v471_v45 = vld [vmem:[#allocation8 + $0x280] sm:$0xff]  ;;  %v473_v46 = vld [vmem:[#allocation8 + $0x290] sm:$0xff] }
 0x16a   :  { %872 = vmatprep.subr.bf16.mxu0 %v662_v47  ;;  %1036 = vmatprep.subr.bf16.mxu1 %v664_v48  ;;  %v382_v47 = vmax.f32 %v375_v39, 0.0  ;;  %v2166_v48 = vpack.c.bf16 %v379_v40, %v379_v40  ;;  %v691_v51 = vunpack.c.l.s8.bf16 %v471_v45  ;;  %v693_v52 = vunpack.c.l.s8.bf16 %v473_v46  ;;  %v492_v40 = vld [vmem:[#allocation8 + $0x328] sm:$0xff] }
 0x16b   :  { %v696_v59 = vunpack.c.h.s8.bf16 %v471_v45  ;;  %v729_v39 = vunpack.c.h.s8.bf16 %v489_v30 }
 0x16c   :  { %v2168_v58 = vpack.c.bf16 %v382_v47, %v382_v47  ;;  %v493_v47 = vld [vmem:[#allocation8 + $0x330] sm:$0xff] }
 0x16d   :  { %873 = vmatpush1.bf16.msra.mxu0 %v661_v54  ;;  %1037 = vmatpush1.bf16.msra.mxu1 %v663_v55  ;;  %v697_v54 = vunpack.c.h.s8.bf16 %v472_v37  ;;  %v699_v55 = vunpack.c.h.s8.bf16 %v474_v38  ;;  %v727_v38 = vunpack.c.h.s8.bf16 %v487_v28 }
 0x16e   :  { %874 = vmatprep.subr.bf16.mxu0 %v667_v56  ;;  %1038 = vmatprep.subr.bf16.mxu1 %v669_v57  ;;  %v477_v56 = vld [vmem:[#allocation8 + $0x2b0] sm:$0xff]  ;;  %v479_v57 = vld [vmem:[#allocation8 + $0x2c0] sm:$0xff] }
 0x16f   :  { %v707_v10 = vunpack.c.h.s8.bf16 %v477_v56 }
 0x171   :  { %875 = vmatpush1.bf16.msra.mxu0 %v666_v61  ;;  %1039 = vmatpush1.bf16.msra.mxu1 %v668_v62  ;;  %v698_v61 = vunpack.c.h.s8.bf16 %v473_v46  ;;  %v702_v62 = vunpack.c.l.s8.bf16 %v477_v56  ;;  %v491_v46 = vld [vmem:[#allocation8 + $0x320] sm:$0xff]  ;;  %v497_v56 = vld [vmem:[#allocation8 + $0x350] sm:$0xff] }
 0x172   :  { %876 = vmatprep.subr.bf16.mxu0 %v672_v63  ;;  %1040 = vmatprep.subr.bf16.mxu1 %v674_v6  ;;  %v704_v63 = vunpack.c.l.s8.bf16 %v479_v57  ;;  %v476_v6 = vld [vmem:[#allocation8 + $0x2a8] sm:$0xff] }
 0x173   :  { %v701_v8 = vunpack.c.l.s8.bf16 %v476_v6 }
 0x175   :  { %877 = vmatpush1.bf16.msra.mxu0 %v671_v11  ;;  %1041 = vmatpush1.bf16.msra.mxu1 %v673_v12  ;;  %v709_v11 = vunpack.c.h.s8.bf16 %v479_v57  ;;  %v482_v12 = vld [vmem:[#allocation8 + $0x2d8] sm:$0xff]  ;;  %v499_v57 = vld [vmem:[#allocation8 + $0x360] sm:$0xff] }
 0x176   :  { %878 = vmatprep.subr.bf16.mxu0 %v677_v13  ;;  %1042 = vmatprep.subr.bf16.mxu1 %v679_v14  ;;  %v484_v13 = vld [vmem:[#allocation8 + $0x2e8] sm:$0xff]  ;;  %v706_v14 = vunpack.c.h.s8.bf16 %v476_v6  ;;  %v712_v17 = vunpack.c.l.s8.bf16 %v482_v12 }
 0x177   :  { %v714_v18 = vunpack.c.l.s8.bf16 %v484_v13  ;;  %v496_v6 = vld [vmem:[#allocation8 + $0x348] sm:$0xff] }
 0x179   :  { %879 = vmatpush1.bf16.msra.mxu0 %v676_v22  ;;  %1043 = vmatpush1.bf16.msra.mxu1 %v678_v23  ;;  %v711_v22 = vunpack.c.l.s8.bf16 %v481_v20  ;;  %v713_v23 = vunpack.c.l.s8.bf16 %v483_v21  ;;  %v501_v21 = vld [vmem:[#allocation8 + $0x370] sm:$0xff] }
 0x17a   :  { %880 = vmatprep.subr.bf16.mxu0 %v682_v25  ;;  %1044 = vmatprep.subr.bf16.mxu1 %v684_v26  ;;  %v717_v25 = vunpack.c.h.s8.bf16 %v482_v12  ;;  %v719_v26 = vunpack.c.h.s8.bf16 %v484_v13  ;;  %v502_v12 = vld [vmem:[#allocation8 + $0x378] sm:$0xff]  ;;  %v504_v13 = vld [vmem:[#allocation8 + $0x388] sm:$0xff] }
 0x17b   :  { %v754_v20 = vunpack.c.l.s8.bf16 %v504_v13  ;;  %v757_v28 = vunpack.c.h.s8.bf16 %v502_v12 }
 0x17d   :  { %881 = vmatpush1.bf16.msra.mxu0 %v681_v27  ;;  %1045 = vmatpush1.bf16.msra.mxu1 %v683_v34  ;;  %v724_v27 = vunpack.c.l.s8.bf16 %v489_v30  ;;  %v486_v34 = vld [vmem:[#allocation8 + $0x2f8] sm:$0xff]  ;;  %v759_v30 = vunpack.c.h.s8.bf16 %v504_v13 }
 0x17e   :  { %882 = vmatprep.subr.bf16.mxu0 %v687_v35  ;;  %1046 = vmatprep.subr.bf16.mxu1 %v689_v36  ;;  %v488_v35 = vld [vmem:[#allocation8 + $0x308] sm:$0xff]  ;;  %v721_v36 = vunpack.c.l.s8.bf16 %v486_v34  ;;  %v518_v13 = vld [vmem:[#allocation8 + $0x3f8] sm:$0xff] }
 0x17f   :  { %v723_v37 = vunpack.c.l.s8.bf16 %v488_v35 }
 0x181   :  { %883 = vmatpush1.bf16.msra.mxu0 %v686_v41  ;;  %1047 = vmatpush1.bf16.msra.mxu1 %v688_v42  ;;  %v494_v41 = vld [vmem:[#allocation8 + $0x338] sm:$0xff]  ;;  %v726_v42 = vunpack.c.h.s8.bf16 %v486_v34  ;;  %v756_v34 = vunpack.c.h.s8.bf16 %v501_v21 }
 0x182   :  { %893 = vmatprep.subr.bf16.mxu0 %v692_v53  ;;  %1057 = vmatprep.subr.bf16.mxu1 %v694_v44  ;;  %v728_v53 = vunpack.c.h.s8.bf16 %v488_v35  ;;  %v732_v44 = vunpack.c.l.s8.bf16 %v492_v40  ;;  %v734_v45 = vunpack.c.l.s8.bf16 %v494_v41 }
 0x184   :  { %885 = vmatmul.mubr.bf16.vlgmr.msra.gmra.mrb[0].mxu0 %v2166_v48  ;;  %1049 = vmatmul.mubr.bf16.vlgmr.msra.gmra.mrb[16].mxu1 %v2166_v48 }
 0x185   :  { %894 = vmatpush1.bf16.msra.mxu0 %v691_v51  ;;  %1058 = vmatpush1.bf16.msra.mxu1 %v693_v52  ;;  %v731_v51 = vunpack.c.l.s8.bf16 %v491_v46  ;;  %v733_v52 = vunpack.c.l.s8.bf16 %v493_v47 }
 0x186   :  { %895 = vmatprep.subr.bf16.mxu0 %v697_v54  ;;  %1059 = vmatprep.subr.bf16.mxu1 %v699_v55  ;;  %v737_v54 = vunpack.c.h.s8.bf16 %v492_v40  ;;  %v739_v55 = vunpack.c.h.s8.bf16 %v494_v41 }
 0x187   :  { %925 = vmatprep.mubr.bf16.mxu0 %v2168_v58  ;;  %1089 = vmatprep.mubr.bf16.mxu1 %v2168_v58 }
 0x189   :  { %896 = vmatpush1.bf16.msra.mxu0 %v696_v59  ;;  %1060 = vmatpush1.bf16.msra.mxu1 %v698_v61  ;;  %v736_v59 = vunpack.c.h.s8.bf16 %v491_v46  ;;  %v738_v61 = vunpack.c.h.s8.bf16 %v493_v47 }
 0x18a   :  { %897 = vmatprep.subr.bf16.mxu0 %v702_v62  ;;  %1061 = vmatprep.subr.bf16.mxu1 %v704_v63  ;;  %v742_v62 = vunpack.c.l.s8.bf16 %v497_v56  ;;  %v744_v63 = vunpack.c.l.s8.bf16 %v499_v57 }
 0x18d   :  { %898 = vmatpush1.bf16.msra.mxu0 %v701_v8  ;;  %1062 = vmatpush1.bf16.msra.mxu1 %v703_v9  ;;  %v741_v8 = vunpack.c.l.s8.bf16 %v496_v6  ;;  %v743_v9 = vunpack.c.l.s8.bf16 %v498_v7 }
 0x18e   :  { %899 = vmatprep.subr.bf16.mxu0 %v707_v10  ;;  %1063 = vmatprep.subr.bf16.mxu1 %v709_v11  ;;  %v747_v10 = vunpack.c.h.s8.bf16 %v497_v56  ;;  %v749_v11 = vunpack.c.h.s8.bf16 %v499_v57  ;;  %v513_v56 = vld [vmem:[#allocation8 + $0x3d0] sm:$0xff] }
 0x191   :  { %900 = vmatpush1.bf16.msra.mxu0 %v706_v14  ;;  %1064 = vmatpush1.bf16.msra.mxu1 %v708_v16  ;;  %v2175_v14 = vsub.s32 4, %v2104_v1  ;;  %v746_v16 = vunpack.c.h.s8.bf16 %v496_v6  ;;  %v517_v6 = vld [vmem:[#allocation8 + $0x3f0] sm:$0xff] }
 0x192   :  { %901 = vmatprep.subr.bf16.mxu0 %v712_v17  ;;  %1065 = vmatprep.subr.bf16.mxu1 %v714_v18  ;;  %v748_v17 = vunpack.c.h.s8.bf16 %v498_v7  ;;  %v752_v18 = vunpack.c.l.s8.bf16 %v502_v12  ;;  %v519_v7 = vld [vmem:[#allocation8 + $0x400] sm:$0xff]  ;;  %v516_v12 = vld [vmem:[#allocation8 + $0x3e8] sm:$0xff] }
 0x195   :  { %902 = vmatpush1.bf16.msra.mxu0 %v711_v22  ;;  %1066 = vmatpush1.bf16.msra.mxu1 %v713_v23  ;;  %v503_v22 = vld [vmem:[#allocation8 + $0x380] sm:$0xff]  ;;  %v310_v23 = vrot.slane %v2112_v3, %v2175_v14 }
 0x196   :  { %903 = vmatprep.subr.bf16.mxu0 %v717_v25  ;;  %1067 = vmatprep.subr.bf16.mxu1 %v719_v26  ;;  %v751_v25 = vunpack.c.l.s8.bf16 %v501_v21  ;;  %v753_v26 = vunpack.c.l.s8.bf16 %v503_v22  ;;  %v758_v35 = vunpack.c.h.s8.bf16 %v503_v22  ;;  %v522_v21 = vld [vmem:[#allocation8 + $0x418] sm:$0xff]  ;;  %v524_v22 = vld [vmem:[#allocation8 + $0x428] sm:$0xff] }
 0x199   :  { %904 = vmatpush1.bf16.msra.mxu0 %v716_v31  ;;  %1068 = vmatpush1.bf16.msra.mxu1 %v718_v32  ;;  %v507_v31 = vld [vmem:[#allocation8 + $0x3a0] sm:$0xff]  ;;  %v509_v32 = vld [vmem:[#allocation8 + $0x3b0] sm:$0xff] }
 0x19a   :  { %905 = vmatprep.subr.bf16.mxu0 %v722_v33  ;;  %1069 = vmatprep.subr.bf16.mxu1 %v724_v27  ;;  %v330_v33 = vmul.f32 %v310_v23, %v2146_v50  ;;  %v354_v27 = vrot.slane %v2117_v5, %v2175_v14  ;;  %v767_v50 = vunpack.c.h.s8.bf16 %v507_v31  ;;  %v317_v23 = vsub.s32 6, %v2104_v1 }
 0x19b   :  { %v799_v1 = vunpack.c.h.s8.bf16 %v524_v22 }
 0x19c   :  { %v374_v40 = vadd.f32 %v354_v27, %v330_v33 }
 0x19d   :  { %906 = vmatpush1.bf16.msra.mxu0 %v721_v36  ;;  %1070 = vmatpush1.bf16.msra.mxu1 %v723_v37  ;;  %v762_v36 = vunpack.c.l.s8.bf16 %v507_v31  ;;  %v764_v37 = vunpack.c.l.s8.bf16 %v509_v32  ;;  %v523_v31 = vld [vmem:[#allocation8 + $0x420] sm:$0xff] }
 0x19e   :  { %907 = vmatprep.subr.bf16.mxu0 %v727_v38  ;;  %1071 = vmatprep.subr.bf16.mxu1 %v729_v39  ;;  %v506_v38 = vld [vmem:[#allocation8 + $0x398] sm:$0xff]  ;;  %v508_v39 = vld [vmem:[#allocation8 + $0x3a8] sm:$0xff]  ;;  %v381_v46 = vmax.f32 %v374_v40, 0.0  ;;  %v793_v27 = vunpack.c.l.s8.bf16 %v523_v31  ;;  %v798_v40 = vunpack.c.h.s8.bf16 %v523_v31  ;;  %v445_v31 = vld [vmem:[#allocation8 + $0x1b0] sm:$0xff] }
 0x19f   :  { %v761_v41 = vunpack.c.l.s8.bf16 %v506_v38  ;;  %v766_v47 = vunpack.c.h.s8.bf16 %v506_v38  ;;  %v362_v38 = vrot.slane %v2117_v5, %v317_v23  ;;  %v415_v5 = vld [vmem:[#allocation8 + $0xc0] sm:$0xff] }
 0x1a0   :  { %v2182_v57 = vpack.c.bf16 %v381_v46, %v381_v46 }
 0x1a1   :  { %908 = vmatpush1.bf16.msra.mxu0 %v726_v42  ;;  %1072 = vmatpush1.bf16.msra.mxu1 %v728_v53  ;;  %v763_v42 = vunpack.c.l.s8.bf16 %v508_v39  ;;  %v769_v53 = vunpack.c.h.s8.bf16 %v509_v32  ;;  %v318_v32 = vrot.slane %v2112_v3, %v317_v23 }
 0x1a2   :  { %909 = vmatprep.subr.bf16.mxu0 %v732_v44  ;;  %1073 = vmatprep.subr.bf16.mxu1 %v734_v45  ;;  %v512_v44 = vld [vmem:[#allocation8 + $0x3c8] sm:$0xff]  ;;  %v514_v45 = vld [vmem:[#allocation8 + $0x3d8] sm:$0xff] }
 0x1a5   :  { %910 = vmatpush1.bf16.msra.mxu0 %v731_v51  ;;  %1074 = vmatpush1.bf16.msra.mxu1 %v733_v52  ;;  %v768_v51 = vunpack.c.h.s8.bf16 %v508_v39  ;;  %v772_v52 = vunpack.c.l.s8.bf16 %v512_v44 }
 0x1a6   :  { %911 = vmatprep.subr.bf16.mxu0 %v737_v54  ;;  %1075 = vmatprep.subr.bf16.mxu1 %v739_v55  ;;  %v774_v54 = vunpack.c.l.s8.bf16 %v514_v45  ;;  %v511_v55 = vld [vmem:[#allocation8 + $0x3c0] sm:$0xff] }
 0x1a9   :  { %912 = vmatpush1.bf16.msra.mxu0 %v736_v59  ;;  %1076 = vmatpush1.bf16.msra.mxu1 %v738_v61  ;;  %v771_v59 = vunpack.c.l.s8.bf16 %v511_v55  ;;  %v773_v61 = vunpack.c.l.s8.bf16 %v513_v56 }
 0x1aa   :  { %913 = vmatprep.subr.bf16.mxu0 %v742_v62  ;;  %1077 = vmatprep.subr.bf16.mxu1 %v744_v63  ;;  %v777_v62 = vunpack.c.h.s8.bf16 %v512_v44  ;;  %v779_v63 = vunpack.c.h.s8.bf16 %v514_v45 }
 0x1ad   :  { %914 = vmatpush1.bf16.msra.mxu0 %v741_v8  ;;  %1078 = vmatpush1.bf16.msra.mxu1 %v743_v9  ;;  %v776_v8 = vunpack.c.h.s8.bf16 %v511_v55  ;;  %v778_v9 = vunpack.c.h.s8.bf16 %v513_v56  ;;  %v575_v55 = vunpack.c.l.s8.bf16 %v415_v5 }
 0x1ae   :  { %915 = vmatprep.subr.bf16.mxu0 %v747_v10  ;;  %1079 = vmatprep.subr.bf16.mxu1 %v749_v11  ;;  %v782_v10 = vunpack.c.l.s8.bf16 %v517_v6  ;;  %v784_v11 = vunpack.c.l.s8.bf16 %v519_v7 }
 0x1b1   :  { %916 = vmatpush1.bf16.msra.mxu0 %v746_v16  ;;  %1080 = vmatpush1.bf16.msra.mxu1 %v748_v17  ;;  %v781_v16 = vunpack.c.l.s8.bf16 %v516_v12  ;;  %v783_v17 = vunpack.c.l.s8.bf16 %v518_v13 }
 0x1b2   :  { %917 = vmatprep.subr.bf16.mxu0 %v752_v18  ;;  %1081 = vmatprep.subr.bf16.mxu1 %v754_v20  ;;  %v787_v18 = vunpack.c.h.s8.bf16 %v517_v6  ;;  %v789_v20 = vunpack.c.h.s8.bf16 %v519_v7  ;;  %v580_v7 = vunpack.c.h.s8.bf16 %v415_v5  ;;  %v475_v5 = vld [vmem:[#allocation8 + $0x2a0] sm:$0xff] }
 0x1b5   :  { %918 = vmatpush1.bf16.msra.mxu0 %v751_v25  ;;  %1082 = vmatpush1.bf16.msra.mxu1 %v753_v26  ;;  %v786_v25 = vunpack.c.h.s8.bf16 %v516_v12  ;;  %v788_v26 = vunpack.c.h.s8.bf16 %v518_v13 }
 0x1b6   :  { %919 = vmatprep.subr.bf16.mxu0 %v757_v28  ;;  %1083 = vmatprep.subr.bf16.mxu1 %v759_v30  ;;  %v792_v28 = vunpack.c.l.s8.bf16 %v522_v21  ;;  %v521_v30 = vld [vmem:[#allocation8 + $0x410] sm:$0xff] }
 0x1b7   :  { %v791_v33 = vunpack.c.l.s8.bf16 %v521_v30  ;;  %v796_v39 = vunpack.c.h.s8.bf16 %v521_v30 }
 0x1b9   :  { %920 = vmatpush1.bf16.msra.mxu0 %v756_v34  ;;  %1084 = vmatpush1.bf16.msra.mxu1 %v758_v35  ;;  %v797_v34 = vunpack.c.h.s8.bf16 %v522_v21  ;;  %v527_v35 = vld [vmem:[#allocation8 + $0x440] sm:$0xff] }
 0x1ba   :  { %921 = vmatprep.subr.bf16.mxu0 %v762_v36  ;;  %1085 = vmatprep.subr.bf16.mxu1 %v764_v37  ;;  %v529_v36 = vld [vmem:[#allocation8 + $0x450] sm:$0xff]  ;;  %v332_v37 = vmul.f32 %v318_v32, %v2152_v19  ;;  %v802_v3 = vunpack.c.l.s8.bf16 %v527_v35  ;;  %v807_v19 = vunpack.c.h.s8.bf16 %v527_v35  ;;  %v470_v35 = vld [vmem:[#allocation8 + $0x278] sm:$0xff] }
 0x1bb   :  { %v809_v46 = vunpack.c.h.s8.bf16 %v529_v36 }
 0x1bd   :  { %922 = vmatpush1.bf16.msra.mxu0 %v761_v41  ;;  %1086 = vmatpush1.bf16.msra.mxu1 %v763_v42  ;;  %v804_v41 = vunpack.c.l.s8.bf16 %v529_v36  ;;  %v526_v42 = vld [vmem:[#allocation8 + $0x438] sm:$0xff] }
 0x1be   :  { %923 = vmatprep.subr.bf16.mxu0 %v767_v50  ;;  %1087 = vmatprep.subr.bf16.mxu1 %v769_v53  ;;  %v528_v50 = vld [vmem:[#allocation8 + $0x448] sm:$0xff]  ;;  %v376_v53 = vadd.f32 %v362_v38, %v332_v37  ;;  %v801_v44 = vunpack.c.l.s8.bf16 %v526_v42  ;;  %v640_v37 = vunpack.c.h.s8.bf16 %v445_v31 }
 0x1bf   :  { %v803_v45 = vunpack.c.l.s8.bf16 %v528_v50 }
 0x1c1   :  { %924 = vmatpush1.bf16.msra.mxu0 %v766_v47  ;;  %1088 = vmatpush1.bf16.msra.mxu1 %v768_v51  ;;  %v455_v47 = vld [vmem:[#allocation8 + $0x200] sm:$0xff]  ;;  %v383_v51 = vmax.f32 %v376_v53, 0.0  ;;  %v690_v53 = vunpack.c.h.s8.bf16 %v470_v35 }
 0x1c2   :  { %934 = vmatprep.subr.bf16.mxu0 %v772_v52  ;;  %1098 = vmatprep.subr.bf16.mxu1 %v774_v54  ;;  %v806_v52 = vunpack.c.h.s8.bf16 %v526_v42  ;;  %v808_v54 = vunpack.c.h.s8.bf16 %v528_v50  ;;  %v655_v56 = vunpack.c.l.s8.bf16 %v455_v47 }
 0x1c4   :  { %926 = vmatmul.mubr.bf16.vlgmr.msra.gmra.mrb[0].mxu0 %v2182_v57  ;;  %1090 = vmatmul.mubr.bf16.vlgmr.msra.gmra.mrb[16].mxu1 %v2182_v57 }
 0x1c5   :  { %935 = vmatpush1.bf16.msra.mxu0 %v771_v59  ;;  %1099 = vmatpush1.bf16.msra.mxu1 %v773_v61  ;;  %v395_v59 = vld [vmem:[#allocation8 + $0x20] sm:$0xff] }
 0x1c6   :  { %936 = vmatprep.subr.bf16.mxu0 %v777_v62  ;;  %1100 = vmatprep.subr.bf16.mxu1 %v779_v63  ;;  %v435_v61 = vld [vmem:[#allocation8 + $0x160] sm:$0xff]  ;;  %v2192_v62 = vpack.c.bf16 %v383_v51, %v383_v51  ;;  %v535_v63 = vunpack.c.l.s8.bf16 %v395_v59  ;;  %v695_v51 = vunpack.c.l.s8.bf16 %v475_v5 }
 0x1c7   :  { %966 = vmatprep.mubr.bf16.mxu0 %v1961_v0  ;;  %1130 = vmatprep.mubr.bf16.mxu1 %v1961_v0  ;;  %v794_v0 = vunpack.c.l.s8.bf16 %v524_v22  ;;  %v615_v6 = vunpack.c.l.s8.bf16 %v435_v61  ;;  %v620_v12 = vunpack.c.h.s8.bf16 %v435_v61 }
 0x1c9   :  { %937 = vmatpush1.bf16.msra.mxu0 %v776_v8  ;;  %1101 = vmatpush1.bf16.msra.mxu1 %v778_v9  ;;  %v660_v8 = vunpack.c.h.s8.bf16 %v455_v47  ;;  %v420_v9 = vld [vmem:[#allocation8 + $0xe8] sm:$0xff]  ;;  %v515_v47 = vld [vmem:[#allocation8 + $0x3e0] sm:$0xff] }
 0x1ca   :  { %938 = vmatprep.subr.bf16.mxu0 %v782_v10  ;;  %1102 = vmatprep.subr.bf16.mxu1 %v784_v11  ;;  %v460_v10 = vld [vmem:[#allocation8 + $0x228] sm:$0xff]  ;;  %v540_v11 = vunpack.c.h.s8.bf16 %v395_v59  ;;  %v585_v13 = vunpack.c.l.s8.bf16 %v420_v9  ;;  %v590_v22 = vunpack.c.h.s8.bf16 %v420_v9  ;;  %v780_v59 = vunpack.c.h.s8.bf16 %v515_v47 }
 0x1cb   :  { %v670_v23 = vunpack.c.h.s8.bf16 %v460_v10 }
 0x1cd   :  { %939 = vmatpush1.bf16.msra.mxu0 %v781_v16  ;;  %1103 = vmatpush1.bf16.msra.mxu1 %v783_v17  ;;  %v400_v16 = vld [vmem:[#allocation8 + $0x48] sm:$0xff]  ;;  %v665_v17 = vunpack.c.l.s8.bf16 %v460_v10 }
 0x1ce   :  { %940 = vmatprep.subr.bf16.mxu0 %v787_v18  ;;  %1104 = vmatprep.subr.bf16.mxu1 %v789_v20  ;;  %v440_v18 = vld [vmem:[#allocation8 + $0x188] sm:$0xff]  ;;  %v545_v20 = vunpack.c.l.s8.bf16 %v400_v16 }
 0x1cf   :  { %v625_v21 = vunpack.c.l.s8.bf16 %v440_v18 }
 0x1d1   :  { %941 = vmatpush1.bf16.msra.mxu0 %v786_v25  ;;  %1105 = vmatpush1.bf16.msra.mxu1 %v788_v26  ;;  %v465_v25 = vld [vmem:[#allocation8 + $0x250] sm:$0xff]  ;;  %v550_v26 = vunpack.c.h.s8.bf16 %v400_v16 }
 0x1d2   :  { %942 = vmatprep.subr.bf16.mxu0 %v792_v28  ;;  %1106 = vmatprep.subr.bf16.mxu1 %v794_v0  ;;  %v405_v0 = vld [vmem:[#allocation8 + $0x70] sm:$0xff]  ;;  %v675_v30 = vunpack.c.l.s8.bf16 %v465_v25 }
 0x1d3   :  { %v555_v32 = vunpack.c.l.s8.bf16 %v405_v0  ;;  %v560_v36 = vunpack.c.h.s8.bf16 %v405_v0  ;;  %v1385_v0 = vld [vmem:[#allocation10 + $0x60] sm:$0xff] }
 0x1d5   :  { %943 = vmatpush1.bf16.msra.mxu0 %v791_v33  ;;  %1107 = vmatpush1.bf16.msra.mxu1 %v793_v27  ;;  %v635_v33 = vunpack.c.l.s8.bf16 %v445_v31 }
 0x1d6   :  { %944 = vmatprep.subr.bf16.mxu0 %v797_v34  ;;  %1108 = vmatprep.subr.bf16.mxu1 %v799_v1  ;;  %v680_v34 = vunpack.c.h.s8.bf16 %v465_v25  ;;  %v430_v1 = vld [vmem:[#allocation8 + $0x138] sm:$0xff] }
 0x1d7   :  { %v605_v38 = vunpack.c.l.s8.bf16 %v430_v1  ;;  %v610_v50 = vunpack.c.h.s8.bf16 %v430_v1 }
 0x1d9   :  { %945 = vmatpush1.bf16.msra.mxu0 %v796_v39  ;;  %1109 = vmatpush1.bf16.msra.mxu1 %v798_v40  ;;  %v410_v39 = vld [vmem:[#allocation8 + $0x98] sm:$0xff]  ;;  %v685_v40 = vunpack.c.l.s8.bf16 %v470_v35 }
 0x1da   :  { %946 = vmatprep.subr.bf16.mxu0 %v802_v3  ;;  %1110 = vmatprep.subr.bf16.mxu1 %v804_v41  ;;  %v450_v3 = vld [vmem:[#allocation8 + $0x1d8] sm:$0xff]  ;;  %v565_v41 = vunpack.c.l.s8.bf16 %v410_v39 }
 0x1db   :  { %v645_v42 = vunpack.c.l.s8.bf16 %v450_v3 }
 0x1dd   :  { %947 = vmatpush1.bf16.msra.mxu0 %v801_v44  ;;  %1111 = vmatpush1.bf16.msra.mxu1 %v803_v45  ;;  %v495_v44 = vld [vmem:[#allocation8 + $0x340] sm:$0xff]  ;;  %v570_v45 = vunpack.c.h.s8.bf16 %v410_v39  ;;  %v1386_v39 = vld [vmem:[#allocation10 + $0x68] sm:$0xff] }
 0x1de   :  { %948 = vmatprep.subr.bf16.mxu0 %v807_v19  ;;  %1112 = vmatprep.subr.bf16.mxu1 %v809_v46  ;;  %v650_v19 = vunpack.c.h.s8.bf16 %v450_v3  ;;  %v735_v46 = vunpack.c.l.s8.bf16 %v495_v44 }
 0x1e1   :  { %949 = vmatpush1.bf16.msra.mxu0 %v806_v52  ;;  %1113 = vmatpush1.bf16.msra.mxu1 %v808_v54  ;;  %v775_v52 = vunpack.c.l.s8.bf16 %v515_v47  ;;  %v740_v54 = vunpack.c.h.s8.bf16 %v495_v44 }
 0x1e2   :  { %1597 = vmatprep.subr.bf16.mxu0 %v575_v55  ;;  %1619 = vmatprep.subr.bf16.mxu1 %v655_v56  ;;  %v500_v55 = vld [vmem:[#allocation8 + $0x368] sm:$0xff]  ;;  %v700_v56 = vunpack.c.h.s8.bf16 %v475_v5 }
 0x1e3   :  { %v745_v61 = vunpack.c.l.s8.bf16 %v500_v55 }
 0x1e4   :  { %967 = vmatmul.mubr.bf16.vlgmr.msra.gmra.mrb[0].mxu0 %v2192_v62  ;;  %1131 = vmatmul.mubr.bf16.vlgmr.msra.gmra.mrb[16].mxu1 %v2192_v62 }
 0x1e5   :  { %1598 = vmatpush3.bf16.msra.mxu0 %v535_v63  ;;  %1171 = vmatprep.mubr.bf16.mxu0 %v2132_v24  ;;  %v425_v24 = vld [vmem:[#allocation8 + $0x110] sm:$0xff]  ;;  %v480_v63 = vld [vmem:[#allocation8 + $0x2c8] sm:$0xff] }
 0x1e6   :  { %1620 = vmatpush3.bf16.msra.mxu1 %v615_v6  ;;  %1211 = vmatprep.mubr.bf16.mxu1 %v2144_v49  ;;  %v630_v49 = vunpack.c.h.s8.bf16 %v440_v18  ;;  %v595_v28 = vunpack.c.l.s8.bf16 %v425_v24  ;;  %v600_v27 = vunpack.c.h.s8.bf16 %v425_v24  ;;  %v520_v6 = vld [vmem:[#allocation8 + $0x408] sm:$0xff]  ;;  %v510_v18 = vld [vmem:[#allocation8 + $0x3b8] sm:$0xff] }
 0x1e7   :  { %1599 = vmatprep.subr.bf16.mxu0 %v580_v7  ;;  %1621 = vmatprep.subr.bf16.mxu1 %v660_v8  ;;  %v705_v7 = vunpack.c.l.s8.bf16 %v480_v63  ;;  %v710_v8 = vunpack.c.h.s8.bf16 %v480_v63  ;;  %v790_v9 = vunpack.c.h.s8.bf16 %v520_v6  ;;  %v530_v24 = vld [vmem:[#allocation8 + $0x458] sm:$0xff] }
 0x1e8   :  { %v810_v31 = vunpack.c.h.s8.bf16 %v530_v24 }
 0x1e9   :  { %1600 = vmatpush3.bf16.msra.mxu0 %v540_v11  ;;  %v485_v11 = vld [vmem:[#allocation8 + $0x2f0] sm:$0xff] }
 0x1ea   :  { %1622 = vmatpush3.bf16.msra.mxu1 %v620_v12  ;;  %1601 = vmatprep.subr.bf16.mxu0 %v585_v13  ;;  %v525_v12 = vld [vmem:[#allocation8 + $0x430] sm:$0xff]  ;;  %v715_v13 = vunpack.c.l.s8.bf16 %v485_v11 }
 0x1eb   :  { %1623 = vmatprep.subr.bf16.mxu1 %v665_v17  ;;  %v795_v16 = vunpack.c.l.s8.bf16 %v525_v12 }
 0x1ed   :  { %1602 = vmatpush3.bf16.msra.mxu0 %v545_v20  ;;  %v720_v20 = vunpack.c.h.s8.bf16 %v485_v11 }
 0x1ee   :  { %1624 = vmatpush3.bf16.msra.mxu1 %v625_v21  ;;  %1603 = vmatprep.subr.bf16.mxu0 %v590_v22  ;;  %v800_v21 = vunpack.c.h.s8.bf16 %v525_v12  ;;  %v765_v22 = vunpack.c.l.s8.bf16 %v510_v18 }
 0x1ef   :  { %1625 = vmatprep.subr.bf16.mxu1 %v670_v23  ;;  %v490_v23 = vld [vmem:[#allocation8 + $0x318] sm:$0xff] }
 0x1f0   :  { %v725_v25 = vunpack.c.l.s8.bf16 %v490_v23 }
 0x1f1   :  { %1604 = vmatpush3.bf16.msra.mxu0 %v550_v26  ;;  %v805_v26 = vunpack.c.l.s8.bf16 %v530_v24 }
 0x1f2   :  { %1626 = vmatpush3.bf16.msra.mxu1 %v630_v49  ;;  %1605 = vmatprep.subr.bf16.mxu0 %v595_v28  ;;  %v770_v49 = vunpack.c.h.s8.bf16 %v510_v18  ;;  %v1377_v28 = vld [vmem:[#allocation10 + $0x20] sm:$0xff] }
 0x1f3   :  { %1627 = vmatprep.subr.bf16.mxu1 %v675_v30  ;;  %v730_v30 = vunpack.c.h.s8.bf16 %v490_v23 }
 0x1f5   :  { %1606 = vmatpush3.bf16.msra.mxu0 %v555_v32  ;;  %v1401_v32 = vunpack.c.l.s8.bf16 %v1377_v28 }
 0x1f6   :  { %1628 = vmatpush3.bf16.msra.mxu1 %v635_v33  ;;  %1607 = vmatprep.subr.bf16.mxu0 %v600_v27  ;;  %v1373_v33 = vld [vmem:[#allocation10] sm:$0xff]  ;;  %v1417_v27 = vunpack.c.l.s8.bf16 %v1385_v0 }
 0x1f7   :  { %1629 = vmatprep.subr.bf16.mxu1 %v680_v34  ;;  %v1381_v34 = vld [vmem:[#allocation10 + $0x40] sm:$0xff]  ;;  %v1393_v1 = vunpack.c.l.s8.bf16 %v1373_v33 }
 0x1f8   :  { %v1409_v35 = vunpack.c.l.s8.bf16 %v1381_v34  ;;  %v1410_v3 = vunpack.c.h.s8.bf16 %v1381_v34 }
 0x1f9   :  { %1608 = vmatpush3.bf16.msra.mxu0 %v560_v36  ;;  %v1402_v36 = vunpack.c.h.s8.bf16 %v1377_v28 }
 0x1fa   :  { %1630 = vmatpush3.bf16.msra.mxu1 %v640_v37  ;;  %1609 = vmatprep.subr.bf16.mxu0 %v605_v38  ;;  %v1418_v37 = vunpack.c.h.s8.bf16 %v1385_v0  ;;  %v1378_v38 = vld [vmem:[#allocation10 + $0x28] sm:$0xff] }
 0x1fb   :  { %1631 = vmatprep.subr.bf16.mxu1 %v685_v40  ;;  %v1394_v40 = vunpack.c.h.s8.bf16 %v1373_v33 }
 0x1fd   :  { %1610 = vmatpush3.bf16.msra.mxu0 %v565_v41  ;;  %v1403_v41 = vunpack.c.l.s8.bf16 %v1378_v38 }
 0x1fe   :  { %1632 = vmatpush3.bf16.msra.mxu1 %v645_v42  ;;  %1611 = vmatprep.subr.bf16.mxu0 %v610_v50  ;;  %v1374_v42 = vld [vmem:[#allocation10 + $0x8] sm:$0xff]  ;;  %v1419_v50 = vunpack.c.l.s8.bf16 %v1386_v39 }
 0x1ff   :  { %1633 = vmatprep.subr.bf16.mxu1 %v690_v53  ;;  %v1382_v53 = vld [vmem:[#allocation10 + $0x48] sm:$0xff]  ;;  %v1395_v44 = vunpack.c.l.s8.bf16 %v1374_v42  ;;  %v1396_v5 = vunpack.c.h.s8.bf16 %v1374_v42 }
 0x200   :  { %v1412_v47 = vunpack.c.h.s8.bf16 %v1382_v53 }
 0x201   :  { %1612 = vmatpush3.bf16.msra.mxu0 %v570_v45  ;;  %v1411_v45 = vunpack.c.l.s8.bf16 %v1382_v53 }
 0x202   :  { %1634 = vmatpush3.bf16.msra.mxu1 %v650_v19  ;;  %1641 = vmatprep.subr.bf16.mxu0 %v735_v46  ;;  %v1404_v19 = vunpack.c.h.s8.bf16 %v1378_v38  ;;  %v1379_v46 = vld [vmem:[#allocation10 + $0x30] sm:$0xff] }
 0x203   :  { %1733 = vmatprep.subr.bf16.mxu1 %v1962_v43 }
 0x204   :  { %1172 = vmatmul.mubr.bf16.vlgmr.msra.gmra.mrb[4].mxu0 %v2138_v29  ;;  %v785_v29 = vunpack.c.l.s8.bf16 %v520_v6 }
 0x205   :  { %1212 = vmatmul.mubr.bf16.vlgmr.msra.gmra.mrb[20].mxu1 %v2166_v48  ;;  %1642 = vmatpush3.bf16.msra.mxu0 %v695_v51  ;;  %v750_v48 = vunpack.c.h.s8.bf16 %v500_v55  ;;  %v1405_v51 = vunpack.c.l.s8.bf16 %v1379_v46  ;;  %v1383_v55 = vld [vmem:[#allocation10 + $0x50] sm:$0xff] }
 0x206   :  { %1251 = vmatprep.mubr.bf16.mxu0 %v2168_v58  ;;  %1734 = vmatpush3.bf16.msra.mxu1 %v775_v52  ;;  %v505_v58 = vld [vmem:[#allocation8 + $0x390] sm:$0xff] }
 0x207   :  { %1643 = vmatprep.subr.bf16.mxu0 %v740_v54  ;;  %1735 = vmatprep.subr.bf16.mxu1 %v1962_v43  ;;  %v755_v10 = vunpack.c.l.s8.bf16 %v505_v58  ;;  %v760_v17 = vunpack.c.h.s8.bf16 %v505_v58  ;;  %v1375_v52 = vld [vmem:[#allocation10 + $0x10] sm:$0xff] }
 0x208   :  { %1749 = vmatprep.mubr.msk.bf16.mxu1 %vm1963_vm1, %v1962_v43  ;;  %v1398_v6 = vunpack.c.h.s8.bf16 %v1375_v52 }
 0x209   :  { %1644 = vmatpush3.bf16.msra.mxu0 %v700_v56  ;;  %v1397_v56 = vunpack.c.l.s8.bf16 %v1375_v52 }
 0x20a   :  { %1736 = vmatpush3.bf16.msra.mxu1 %v780_v59  ;;  %1645 = vmatprep.subr.bf16.mxu0 %v745_v61  ;;  %v1413_v59 = vunpack.c.l.s8.bf16 %v1383_v55  ;;  %v1406_v61 = vunpack.c.h.s8.bf16 %v1379_v46 }
 0x20b   :  { %1737 = vmatprep.subr.bf16.mxu1 %v1962_v43 }
 0x20d   :  { %1646 = vmatpush3.bf16.msra.mxu0 %v705_v7  ;;  %v1414_v7 = vunpack.c.h.s8.bf16 %v1383_v55  ;;  %v1392_v55 = vld [vmem:[#allocation10 + $0x98] sm:$0xff] }
 0x20e   :  { %1738 = vmatpush3.bf16.msra.mxu1 %v785_v29  ;;  %1647 = vmatprep.subr.bf16.mxu0 %v750_v48  ;;  %v1380_v29 = vld [vmem:[#allocation10 + $0x38] sm:$0xff] }
 0x20f   :  { %1739 = vmatprep.subr.bf16.mxu1 %v1962_v43  ;;  %v1388_v48 = vld [vmem:[#allocation10 + $0x78] sm:$0xff]  ;;  %v1407_v58 = vunpack.c.l.s8.bf16 %v1380_v29 }
 0x211   :  { %1648 = vmatpush3.bf16.msra.mxu0 %v710_v8  ;;  %v1423_v8 = vunpack.c.l.s8.bf16 %v1388_v48 }
 0x212   :  { %1740 = vmatpush3.bf16.msra.mxu1 %v790_v9  ;;  %1649 = vmatprep.subr.bf16.mxu0 %v755_v10  ;;  %v1376_v9 = vld [vmem:[#allocation10 + $0x18] sm:$0xff] }
 0x213   :  { %1741 = vmatprep.subr.bf16.mxu1 %v1962_v43  ;;  %v1384_v10 = vld [vmem:[#allocation10 + $0x58] sm:$0xff]  ;;  %v1399_v11 = vunpack.c.l.s8.bf16 %v1376_v9 }
 0x214   :  { %v1415_v12 = vunpack.c.l.s8.bf16 %v1384_v10  ;;  %v1416_v18 = vunpack.c.h.s8.bf16 %v1384_v10  ;;  %v1432_v10 = vunpack.c.h.s8.bf16 %v1392_v55 }
 0x215   :  { %1650 = vmatpush3.bf16.msra.mxu0 %v715_v13  ;;  %v1408_v13 = vunpack.c.h.s8.bf16 %v1380_v29 }
 0x216   :  { %1742 = vmatpush3.bf16.msra.mxu1 %v795_v16  ;;  %1651 = vmatprep.subr.bf16.mxu0 %v760_v17  ;;  %v1424_v16 = vunpack.c.h.s8.bf16 %v1388_v48  ;;  %v1400_v17 = vunpack.c.h.s8.bf16 %v1376_v9 }
 0x217   :  { %1743 = vmatprep.subr.bf16.mxu1 %v1962_v43 }
 0x219   :  { %1652 = vmatpush3.bf16.msra.mxu0 %v720_v20  ;;  %v2217_v20 = vld [vmem:[%s2276_s5] sm:$0x1f] }
 0x21a   :  { %1744 = vmatpush3.bf16.msra.mxu1 %v800_v21  ;;  %1653 = vmatprep.subr.bf16.mxu0 %v765_v22  ;;  %v2222_v21 = vld [vmem:[%s2277_s6] sm:$0x1f]  ;;  %v1304_v22 = vrot.slane %v2217_v20, %v2107_v2  ;;  %v1312_v23 = vrot.slane %v2217_v20, %v2155_v60  ;;  %v1308_v24 = vrot.slane %v2217_v20, %v2115_v4 }
 0x21b   :  { %1745 = vmatprep.subr.bf16.mxu1 %v1962_v43 }
 0x21d   :  { %1654 = vmatpush3.bf16.msra.mxu0 %v725_v25  ;;  %v1316_v25 = vrot.slane %v2217_v20, %v2128_v15 }
 0x21e   :  { %1746 = vmatpush3.bf16.msra.mxu1 %v805_v26  ;;  %1655 = vmatprep.subr.bf16.mxu0 %v770_v49  ;;  %v1336_v26 = vrot.slane %v2222_v21, %v2107_v2  ;;  %v1344_v49 = vrot.slane %v2222_v21, %v2155_v60 }
 0x21f   :  { %1747 = vmatprep.subr.bf16.mxu1 %v1962_v43 }
 0x221   :  { %1656 = vmatpush3.bf16.msra.mxu0 %v730_v30  ;;  %v1340_v30 = vrot.slane %v2222_v21, %v2115_v4  ;;  %v1389_v4 = vld [vmem:[#allocation10 + $0x80] sm:$0xff] }
 0x222   :  { %1748 = vmatpush3.bf16.msra.mxu1 %v810_v31  ;;  %1672 = vmatprep.subr.bf16.mxu0 %v1401_v32  ;;  %v1348_v31 = vrot.slane %v2222_v21, %v2128_v15  ;;  %v1426_v46 = vunpack.c.h.s8.bf16 %v1389_v4 }
 0x223   :  { %1694 = vmatprep.subr.bf16.mxu1 %v1417_v27 }
 0x224   :  { %1252 = vmatmul.mubr.bf16.vlgmr.msra.gmra.mrb[8].mxu0 %v2182_v57  ;;  %v1420_v57 = vunpack.c.h.s8.bf16 %v1386_v39 }
 0x225   :  { %1750 = vmatmul.mubr.bf16.vlgmr.msra.gmra.mrb[24].mxu1 %v2192_v62  ;;  %1673 = vmatpush3.bf16.msra.mxu0 %v1393_v1  ;;  %v1387_v62 = vld [vmem:[#allocation10 + $0x70] sm:$0xff] }
 0x226   :  { %1695 = vmatpush3.bf16.msra.mxu1 %v1409_v35  ;;  %1674 = vmatprep.subr.bf16.mxu0 %v1402_v36  ;;  %v1421_v54 = vunpack.c.l.s8.bf16 %v1387_v62  ;;  %v1422_v63 = vunpack.c.h.s8.bf16 %v1387_v62  ;;  %v1390_v62 = vld [vmem:[#allocation10 + $0x88] sm:$0xff] }
 0x227   :  { %1696 = vmatprep.subr.bf16.mxu1 %v1418_v37 }
 0x229   :  { %1675 = vmatpush3.bf16.msra.mxu0 %v1394_v40 }
 0x22a   :  { %1697 = vmatpush3.bf16.msra.mxu1 %v1410_v3  ;;  %1676 = vmatprep.subr.bf16.mxu0 %v1403_v41 }
 0x22b   :  { %1698 = vmatprep.subr.bf16.mxu1 %v1419_v50 }
 0x22d   :  { %1677 = vmatpush3.bf16.msra.mxu0 %v1395_v44 }
 0x22e   :  { %1699 = vmatpush3.bf16.msra.mxu1 %v1411_v45  ;;  %1678 = vmatprep.subr.bf16.mxu0 %v1404_v19  ;;  %v1425_v45 = vunpack.c.l.s8.bf16 %v1389_v4 }
 0x22f   :  { %1700 = vmatprep.subr.bf16.mxu1 %v1420_v57 }
 0x231   :  { %1679 = vmatpush3.bf16.msra.mxu0 %v1396_v5  ;;  %v1427_v5 = vunpack.c.l.s8.bf16 %v1390_v62 }
 0x232   :  { %1701 = vmatpush3.bf16.msra.mxu1 %v1412_v47  ;;  %1680 = vmatprep.subr.bf16.mxu0 %v1405_v51  ;;  %v1428_v47 = vunpack.c.h.s8.bf16 %v1390_v62  ;;  %v1391_v51 = vld [vmem:[#allocation10 + $0x90] sm:$0xff] }
 0x233   :  { %1702 = vmatprep.subr.bf16.mxu1 %v1421_v54  ;;  %v1429_v52 = vunpack.c.l.s8.bf16 %v1391_v51  ;;  %v1430_v54 = vunpack.c.h.s8.bf16 %v1391_v51 }
 0x235   :  { %1681 = vmatpush3.bf16.msra.mxu0 %v1397_v56 }
 0x236   :  { %1703 = vmatpush3.bf16.msra.mxu1 %v1413_v59  ;;  %1682 = vmatprep.subr.bf16.mxu0 %v1406_v61  ;;  %v1431_v59 = vunpack.c.l.s8.bf16 %v1392_v55 }
 0x237   :  { %1704 = vmatprep.subr.bf16.mxu1 %v1422_v63 }
 0x239   :  { %1683 = vmatpush3.bf16.msra.mxu0 %v1398_v6 }
 0x23a   :  { %1705 = vmatpush3.bf16.msra.mxu1 %v1414_v7  ;;  %1684 = vmatprep.subr.bf16.mxu0 %v1407_v58 }
 0x23b   :  { %1706 = vmatprep.subr.bf16.mxu1 %v1423_v8 }
 0x23d   :  { %1685 = vmatpush3.bf16.msra.mxu0 %v1399_v11 }
 0x23e   :  { %1707 = vmatpush3.bf16.msra.mxu1 %v1415_v12  ;;  %1686 = vmatprep.subr.bf16.mxu0 %v1408_v13 }
 0x23f   :  { %1708 = vmatprep.subr.bf16.mxu1 %v1424_v16 }
 0x241   :  { %1687 = vmatpush3.bf16.msra.mxu0 %v1400_v17 }
 0x242   :  { %1709 = vmatpush3.bf16.msra.mxu1 %v1416_v18  ;;  %1753 = vmatprep.subr.bf16.mxu0 %v1962_v43 }
 0x2b7   :  { %v968_v28 = vpop.f32.mrb[0].mxu0  ;;  %v1132_v0 = vpop.f32.mrb[16].mxu1 }
 0x2b8   :  { %v1326_v32 = vmul.f32 %v1304_v22, %v968_v28  ;;  %v1328_v33 = vmul.f32 %v1312_v23, %v1132_v0  ;;  %v970_v27 = vpop.f32.mrb[1].mxu0  ;;  %v1134_v34 = vpop.f32.mrb[17].mxu1  ;;  %v1352_v0 = vrot.slane %v2222_v21, %v2175_v14 }
 0x2b9   :  { %v1327_v1 = vmul.f32 %v1308_v24, %v970_v27  ;;  %v1329_v35 = vmul.f32 %v1316_v25, %v1134_v34  ;;  %v972_v36 = vpop.f32.mrb[2].mxu0  ;;  %v1136_v37 = vpop.f32.mrb[18].mxu1 }
 0x2ba   :  { %v1358_v2 = vadd.f32 %v1336_v26, %v1326_v32  ;;  %v1360_v38 = vadd.f32 %v1344_v49, %v1328_v33  ;;  %v973_v39 = vpop.f32.mrb[3].mxu0  ;;  %v1137_v60 = vpop.f32.mrb[19].mxu1  ;;  %v1320_v26 = vrot.slane %v2217_v20, %v2175_v14  ;;  %v1592_v14 = vld [vmem:[%s2279_s8] ss:$0 sm:$0xff] }
 0x2bb   :  { %v1359_v40 = vadd.f32 %v1340_v30, %v1327_v1  ;;  %v1361_v3 = vadd.f32 %v1348_v31, %v1329_v35 }
 0x2bc   :  { %v1363_v41 = vmax.f32 %v1358_v2, 0.0  ;;  %v1365_v42 = vmax.f32 %v1360_v38, 0.0 }
 0x2bd   :  { %v1364_v50 = vmax.f32 %v1359_v40, 0.0  ;;  %v1366_v53 = vmax.f32 %v1361_v3, 0.0  ;;  %v1593_v3 = vld [vmem:[%s2280_s9] ss:$0 sm:$0xff] }
 0x2be   :  { %v1368_v19 = vpack.c.bf16 %v1363_v41, %v1363_v41  ;;  %v1370_v57 = vpack.c.bf16 %v1365_v42, %v1365_v42 }
 0x2bf   :  { %v1369_v15 = vpack.c.bf16 %v1364_v50, %v1364_v50  ;;  %v1371_v44 = vpack.c.bf16 %v1366_v53, %v1366_v53 }
 0x2c1   :  { %1465 = vmatprep.mubr.bf16.mxu0 %v1369_v15  ;;  %1505 = vmatprep.mubr.bf16.mxu1 %v1371_v44 }
 0x2c2   :  { %1466 = vmatmul.mubr.bf16.vlgmr.msra.gmra.mrb[12].mxu0 %v1368_v19  ;;  %1506 = vmatmul.mubr.bf16.vlgmr.msra.gmra.mrb[28].mxu1 %v1370_v57 }
 0x2c3   :  { %1754 = vmatpush3.bf16.msra.mxu0 %v1425_v45  ;;  %1769 = vmatprep.mubr.msk.bf16.mxu0 %vm1963_vm1, %v1962_v43 }
 0x2c4   :  { %1755 = vmatprep.subr.bf16.mxu0 %v1962_v43 }
 0x2c7   :  { %1756 = vmatpush3.bf16.msra.mxu0 %v1426_v46 }
 0x2c8   :  { %1757 = vmatprep.subr.bf16.mxu0 %v1962_v43 }
 0x2cb   :  { %1758 = vmatpush3.bf16.msra.mxu0 %v1427_v5 }
 0x2cc   :  { %1759 = vmatprep.subr.bf16.mxu0 %v1962_v43 }
 0x2cf   :  { %1760 = vmatpush3.bf16.msra.mxu0 %v1428_v47 }
 0x2d0   :  { %1761 = vmatprep.subr.bf16.mxu0 %v1962_v43 }
 0x2d3   :  { %1762 = vmatpush3.bf16.msra.mxu0 %v1429_v52 }
 0x2d4   :  { %1763 = vmatprep.subr.bf16.mxu0 %v1962_v43 }
 0x2d7   :  { %v1613_v56 = vpop.f32.mrb[4].mxu0  ;;  %1764 = vmatpush3.bf16.msra.mxu0 %v1430_v54 }
 0x2d8   :  { %v1635_v61 = vpop.f32.mrb[20].mxu1  ;;  %v1614_v63 = vpop.f32.mrb[5].mxu0  ;;  %1765 = vmatprep.subr.bf16.mxu0 %v1962_v43 }
 0x2d9   :  { %v1615_v6 = vadd.f32 %v1614_v63, %v1613_v56  ;;  %v1636_v7 = vpop.f32.mrb[21].mxu1  ;;  %v1616_v29 = vpop.f32.mrb[6].mxu0 }
 0x2da   :  { %v1637_v48 = vadd.f32 %v1636_v7, %v1635_v61  ;;  %v1638_v58 = vpop.f32.mrb[22].mxu1  ;;  %v1617_v8 = vpop.f32.mrb[7].mxu0 }
 0x2db   :  { %v1639_v9 = vpop.f32.mrb[23].mxu1  ;;  %1766 = vmatpush3.bf16.msra.mxu0 %v1431_v59 }
 0x2dc   :  { %v1214_v11 = vadd.f32 %v1637_v48, %v1615_v6  ;;  %1767 = vmatprep.subr.bf16.mxu0 %v1962_v43 }
 0x2df   :  { %1768 = vmatpush3.bf16.msra.mxu0 %v1432_v10 }
 0x2f7   :  { %v1657_v12 = vpop.f32.mrb[8].mxu0 }
 0x2f8   :  { %v1293_v13 = vpop.f32.mrb[24].mxu1  ;;  %v1658_v16 = vpop.f32.mrb[9].mxu0 }
 0x2f9   :  { %v1659_v17 = vadd.f32 %v1658_v16, %v1657_v12  ;;  %v1751_v18 = vpop.f32.mrb[25].mxu1  ;;  %v1660_v22 = vpop.f32.mrb[10].mxu0 }
 0x2fa   :  { %v1296_v23 = vpop.f32.mrb[26].mxu1  ;;  %v1661_v24 = vpop.f32.mrb[11].mxu0 }
 0x2fb   :  { %v1254_v25 = vadd.f32 %v1659_v17, %v1214_v11  ;;  %v1752_v49 = vpop.f32.mrb[27].mxu1 }
 0x2fd   :  { %v1294_v28 = vadd.f32 %v1293_v13, %v1254_v25 }
 0x2ff   :  { %v1330_v30 = vmul.f32 %v1320_v26, %v1294_v28 }
 0x301   :  { %v1362_v43 = vadd.f32 %v1352_v0, %v1330_v30 }
 0x303   :  { %v1367_v31 = vmax.f32 %v1362_v43, 0.0 }
 0x305   :  { %v1372_v32 = vpack.c.bf16 %v1367_v31, %v1367_v31 }
 0x307   :  { %1770 = vmatmul.mubr.bf16.vlgmr.msra.gmra.mrb[16].mxu0 %v1372_v32 }
 0x395   :  { %v1688_v33 = vpop.f32.mrb[12].mxu0  ;;  %v1710_v27 = vpop.f32.mrb[28].mxu1 }
 0x396   :  { %v1689_v34 = vpop.f32.mrb[13].mxu0  ;;  %v1711_v1 = vpop.f32.mrb[29].mxu1 }
 0x397   :  { %v1690_v35 = vadd.f32 %v1689_v34, %v1688_v33  ;;  %v1712_v36 = vadd.f32 %v1711_v1, %v1710_v27  ;;  %v1691_v37 = vpop.f32.mrb[14].mxu0  ;;  %v1713_v2 = vpop.f32.mrb[30].mxu1 }
 0x398   :  { %v1692_v38 = vpop.f32.mrb[15].mxu0  ;;  %v1714_v20 = vpop.f32.mrb[31].mxu1 }
 0x399   :  { %v1508_v39 = vadd.f32 %v1712_v36, %v1690_v35 }
 0x3da   :  { %v1547_v60 = vpop.f32.mrb[16].mxu0 }
 0x3db   :  { %v1548_v21 = vadd.f32 %v1547_v60, %v1508_v39  ;;  %v1771_v40 = vpop.f32.mrb[17].mxu0 }
 0x3dc   :  { %v1550_v41 = vpop.f32.mrb[18].mxu0 }
 0x3dd   :  { %v1560_v42 = vmul.f32 %v1592_v14, %v1548_v21  ;;  %v1772_v4 = vpop.f32.mrb[19].mxu0 }
 0x3df   :  { %v1568_v50 = vadd.f32 %v1593_v3, %v1560_v42 }
 0x3e1   :  { %1810 = vtanh.f32 %v1568_v50 }
 0x3eb   :  { %v1811_v53 = vpop.eup %1810 }
 0x3ec   :  { %1570 = vst [vmem:[#allocation11] sm:$0xff] %v1811_v53 }
 0x3ed   :  { %1933 = shalt.err (!%p1930_p2)
}
 0x3ee   :  { %s1934_s9 = scalar_lea.hbm %s2281_s10, 128 }
 0x3ef   :  { %p1935_p3 = scmp.ne.s32.totalorder %s2281_s10, %s1934_s9  ;;  %p1938_p4 = scmp.lt.u32.totalorder %s1934_s9, %s2281_s10 }
 0x3f1   :  { %p1940_p5 = pnand %p1938_p4, %p1935_p3 }
 0x3f3   :  { %1943 = shalt.err (!%p1940_p5)
}
 0x3f4   :  { %1580 = dma.vmem_to_hbm [thread:$0]  %s1578_s19, 128, %s2281_s10, [#allocation4]  }
 0x3f5   :  { %1950 = dma.done.wait [#allocation4], 128  }
 0x3f6   :  { %1951 = vsyncadd [#allocation4], 4294967168 }
 0x3f7   :  { %1584 = vsyncpa [#allocation3], 1 }
 0x3f8   :  { %1585 = vsyncpa [#allocation6], 1 }
 0x3f9   :  { %1586 = vsyncpa [#allocation9], 1 }
 0x3fa   :  { %1587 = vsyncpa [#allocation4], 1 }

</bundles_post_ra>
